<compile_context>
chip_gen: v6e
topology: v6e:2x2x1
jax: 0.10.0
libtpu: 0.0.40
codegen_flags: <defaults>
</compile_context>

<pallas_src>
import jax
import jax.numpy as jnp
from jax.experimental import pallas as pl
from jax.experimental.pallas import tpu as pltpu

# ----- synthetic hyperparameters (DECISION_DIM is a module-level global in the
#       original repo; small demo values here) -----
DECISION_DIM = 8
MAX_LEN = 32
LATENT_DIM = 8

K1, K2, K3 = 9, 9, 11          # conv kernel widths
C1, C2, C3 = 9, 9, 10          # conv output channels
L1 = MAX_LEN - K1 + 1          # 24
L2 = L1 - K2 + 1               # 16
L3 = L2 - K3 + 1               # 6  == self.last_conv_size
HID = 435

F0 = MAX_LEN * DECISION_DIM    # 256  flattened input features (NCL: c*MAX_LEN + l)
F1 = L1 * C1                   # 216  conv1 features (t*C1 + o)
F2 = L2 * C2                   # 144  conv2 features
F3 = L3 * C3                   # 60   conv3 features
HEAD = 2 * LATENT_DIM          # 16   fused mean/logvar head width


def _round_up(n, m):
    return ((n + m - 1) // m) * m


F1P = _round_up(F1, 128)       # 256
F2P = _round_up(F2, 128)       # 256
F3P = _round_up(F3, 128)       # 128
HIDP = _round_up(HID, 128)     # 512

TB = 512                       # default batch tile (rows per grid step)


# --------------------------------------------------------------------------
# Pallas kernel: one batch tile = 5 chained MXU matmuls (bf16 x bf16 -> f32)
# --------------------------------------------------------------------------
def _encoder_kernel(x_ref,
                    w1_ref, b1_ref,
                    w2_ref, b2_ref,
                    w3_ref, b3_ref,
                    w4_ref, b4_ref,
                    w5_ref, b5_ref,
                    out_ref):
    h = x_ref[...]                                                    # (TB, F0) bf16
    # conv1 + relu (dense Toeplitz form, NCL row ordering folded into weight)
    h = jnp.maximum(jnp.dot(h, w1_ref[...], preferred_element_type=jnp.float32)
                    + b1_ref[...], 0.0).astype(jnp.bfloat16)          # (TB, F1P)
    # conv2 + relu
    h = jnp.maximum(jnp.dot(h, w2_ref[...], preferred_element_type=jnp.float32)
                    + b2_ref[...], 0.0).astype(jnp.bfloat16)          # (TB, F2P)
    # conv3 + relu
    h = jnp.maximum(jnp.dot(h, w3_ref[...], preferred_element_type=jnp.float32)
                    + b3_ref[...], 0.0).astype(jnp.bfloat16)          # (TB, F3P)
    # fc (w1) + relu
    h = jnp.maximum(jnp.dot(h, w4_ref[...], preferred_element_type=jnp.float32)
                    + b4_ref[...], 0.0).astype(jnp.bfloat16)          # (TB, HIDP)
    # fused mean / log-var heads
    z = jnp.dot(h, w5_ref[...], preferred_element_type=jnp.float32) + b5_ref[...]
    # lane-dense store: last dim is the batch tile (>= 128 lanes, unmasked vst)
    out_ref[...] = z.T                                                # (HEAD, TB)


# --------------------------------------------------------------------------
# One-time weight preparation (Toeplitz expansion, layout folding, padding)
# --------------------------------------------------------------------------
def _conv_as_dense_ncl(conv_w, l_in):
    """Conv1d weight (C_out, C_in, K) -> dense (C_in*L_in, L_out*C_out).
    Input row index = c*L_in + l (raw NCL flatten of x), column = t*C_out + o."""
    c_out, c_in, k = conv_w.shape
    l_out = l_in - k + 1
    wt = jnp.transpose(conv_w, (1, 2, 0))                   # (C_in, K, C_out)
    cols = [jnp.pad(wt, ((0, 0), (t, l_in - k - t), (0, 0))) for t in range(l_out)]
    big = jnp.stack(cols, axis=2)                           # (C_in, L_in, L_out, C_out)
    return big.reshape(c_in * l_in, l_out * c_out)


def _conv_as_dense_lc(conv_w, l_in):
    """Conv1d weight (C_out, C_in, K) -> dense (L_in*C_in, L_out*C_out).
    Input row index = l*C_in + c (matches previous layer's t*C_out+o columns)."""
    c_out, c_in, k = conv_w.shape
    l_out = l_in - k + 1
    wt = jnp.transpose(conv_w, (2, 1, 0))                   # (K, C_in, C_out)
    cols = [jnp.pad(wt, ((t, l_in - k - t), (0, 0), (0, 0))) for t in range(l_out)]
    big = jnp.stack(cols, axis=2)                           # (L_in, C_in, L_out, C_out)
    return big.reshape(l_in * c_in, l_out * c_out)


def _conv_bias_as_dense(conv_b, l_out):
    return jnp.tile(conv_b, l_out).reshape(1, l_out * conv_b.shape[0])


def _pad2(a, rows, cols):
    return jnp.pad(a, ((0, rows - a.shape[0]), (0, cols - a.shape[1])))


def prepare_encoder_weights(params):
    """Build the dense matmul weights ONCE (off the per-call hot path).
    All feature widths are zero-padded to multiples of 128 (exact through ReLU)."""
    w1 = _pad2(_conv_as_dense_ncl(params["conv1_w"], MAX_LEN), F0, F1P)   # (256, 256)
    b1 = _pad2(_conv_bias_as_dense(params["conv1_b"], L1), 1, F1P)
    w2 = _pad2(_conv_as_dense_lc(params["conv2_w"], L1), F1P, F2P)        # (256, 256)
    b2 = _pad2(_conv_bias_as_dense(params["conv2_b"], L2), 1, F2P)
    w3 = _pad2(_conv_as_dense_lc(params["conv3_w"], L2), F2P, F3P)        # (256, 128)
    b3 = _pad2(_conv_bias_as_dense(params["conv3_b"], L3), 1, F3P)

    # fc: PyTorch flattens h3 (C3, L3) channel-major (c*L3 + t); our conv3 output
    # columns are ordered t*C3 + c, so permute the fc weight rows to match.
    w4 = jnp.transpose(params["w1_w"].reshape(HID, C3, L3), (2, 1, 0)).reshape(F3, HID)
    w4 = _pad2(w4, F3P, HIDP)                                             # (128, 512)
    b4 = _pad2(params["w1_b"].reshape(1, HID), 1, HIDP)

    # Fused mean / log-var heads: columns [0:LAT] = mean, [LAT:2*LAT] = log_var.
    w5 = jnp.concatenate([params["mean_w"].T, params["logvar_w"].T], axis=1)   # (435, 16)
    w5 = _pad2(w5, HIDP, HEAD)                                            # (512, 16)
    b5 = jnp.concatenate([params["mean_b"], params["logvar_b"]]).reshape(1, HEAD)

    bf = lambda a: a.astype(jnp.bfloat16)
    f32 = lambda a: a.astype(jnp.float32)
    return (bf(w1), f32(b1), bf(w2), f32(b2), bf(w3), f32(b3),
            bf(w4), f32(b4), bf(w5), f32(b5))


# --------------------------------------------------------------------------
# Forward: single reshape + one pallas_call
# --------------------------------------------------------------------------
def cnn_encoder_forward(x_ncl, prepped, tb=TB):
    """x_ncl: (B, DECISION_DIM, MAX_LEN) array (PyTorch NCL layout).
    prepped: output of prepare_encoder_weights(params)."""
    B = x_ncl.shape[0]
    # Cap the tile near the batch size (keeps M >= 128 for the MXU; avoids
    # burning a whole 512-row tile on a tiny serving batch).
    tb = max(128, min(tb, _round_up(B, 128)))
    n_tiles = pl.cdiv(B, tb)

    # Raw NCL flatten (row index c*MAX_LEN + l); the NCL->NLC permutation lives
    # in w1's row ordering, so no wrapper transpose and no batch pad.  Rows past
    # B in the ragged final block hold unspecified data; every op is row-wise and
    # those rows land only in output columns >= B, which are sliced off below.
    x = x_ncl.reshape(B, F0).astype(jnp.bfloat16)

    def _resident(arr):  # full-array block, constant index_map -> stays in VMEM
        return pl.BlockSpec(arr.shape, lambda i: (0, 0))

    in_specs = [pl.BlockSpec((tb, F0), lambda i: (i, 0))]
    in_specs += [_resident(a) for a in prepped]
    out_specs = pl.BlockSpec((HEAD, tb), lambda i: (0, i))
    out_shape = jax.ShapeDtypeStruct((HEAD, n_tiles * tb), jnp.float32)

    z = pl.pallas_call(
        _encoder_kernel,
        grid=(n_tiles,),
        in_specs=in_specs,
        out_specs=out_specs,
        out_shape=out_shape,
        compiler_params=pltpu.CompilerParams(
            dimension_semantics=("parallel",)),
    )(x, *prepped)

    z = z.T[:B]                                              # (B, 2*LATENT)
    return z[:, :LATENT_DIM], z[:, LATENT_DIM:]


# --------------------------------------------------------------------------
# Pure-JAX f32 reference (mirrors the PyTorch forward) for a correctness check
# --------------------------------------------------------------------------
def _ref_forward(x_ncl, params):
    x = x_ncl.astype(jnp.float32)

    def conv1d(inp, w, b):
        K = w.shape[2]
        Lout = inp.shape[2] - K + 1
        acc = jnp.zeros((inp.shape[0], w.shape[0], Lout), jnp.float32)
        for k in range(K):
            acc = acc + jnp.einsum('bct,oc->bot', inp[:, :, k:k + Lout], w[:, :, k])
        return acc + b[None, :, None]

    h1 = jax.nn.relu(conv1d(x, params["conv1_w"], params["conv1_b"]))
    h2 = jax.nn.relu(conv1d(h1, params["conv2_w"], params["conv2_b"]))
    h3 = jax.nn.relu(conv1d(h2, params["conv3_w"], params["conv3_b"]))
    flat = h3.reshape(x.shape[0], -1)                        # channel-major flatten
    h = jax.nn.relu(flat @ params["w1_w"].T + params["w1_b"])
    zm = h @ params["mean_w"].T + params["mean_b"]
    zv = h @ params["logvar_w"].T + params["logvar_b"]
    return zm, zv


def _init_params(key):
    ks = jax.random.split(key, 12)
    return {
        "conv1_w": 0.1 * jax.random.normal(ks[0], (C1, DECISION_DIM, K1), jnp.float32),
        "conv1_b": 0.1 * jax.random.normal(ks[1], (C1,), jnp.float32),
        "conv2_w": 0.1 * jax.random.normal(ks[2], (C2, C1, K2), jnp.float32),
        "conv2_b": 0.1 * jax.random.normal(ks[3], (C2,), jnp.float32),
        "conv3_w": 0.1 * jax.random.normal(ks[4], (C3, C2, K3), jnp.float32),
        "conv3_b": 0.1 * jax.random.normal(ks[5], (C3,), jnp.float32),
        "w1_w":    0.1 * jax.random.normal(ks[6], (HID, L3 * C3), jnp.float32),
        "w1_b":    0.1 * jax.random.normal(ks[7], (HID,), jnp.float32),
        "mean_w":  0.1 * jax.random.normal(ks[8], (LATENT_DIM, HID), jnp.float32),
        "mean_b":  0.1 * jax.random.normal(ks[9], (LATENT_DIM,), jnp.float32),
        "logvar_w": 0.1 * jax.random.normal(ks[10], (LATENT_DIM, HID), jnp.float32),
        "logvar_b": 0.1 * jax.random.normal(ks[11], (LATENT_DIM,), jnp.float32),
    }


if __name__ == "__main__":
    key = jax.random.PRNGKey(0)
    k_params, k_x = jax.random.split(key)
    params = _init_params(k_params)

    B = 2
    # PyTorch-style input layout: (batch, DECISION_DIM, max_len)
    x = jax.random.normal(k_x, (B, DECISION_DIM, MAX_LEN), jnp.float32)

    # Dense Toeplitz weights built once, outside the per-batch jitted forward.
    prepped = prepare_encoder_weights(params)

    fwd = jax.jit(cnn_encoder_forward)
    z_mean, z_log_var = fwd(x, prepped)
    jax.block_until_ready((z_mean, z_log_var))

    zm_ref, zv_ref = _ref_forward(x, params)
    assert z_mean.shape == (B, LATENT_DIM) and z_log_var.shape == (B, LATENT_DIM)
    # bf16 operands / f32 accumulation -> looser tolerance than the f32 reference.
    assert jnp.allclose(z_mean, zm_ref, atol=5e-2, rtol=5e-2)
    assert jnp.allclose(z_log_var, zv_ref, atol=5e-2, rtol=5e-2)

    print("KERNEL_OK")
</pallas_src>

<mosaic_0001>
module attributes {stable_mosaic.version = 11 : i64} {
  func.func @_encoder_kernel(%arg0: i32, %arg1: memref<128x256xbf16, #tpu.memory_space<vmem>>, %arg2: memref<256x256xbf16, #tpu.memory_space<vmem>>, %arg3: memref<1x256xf32, #tpu.memory_space<vmem>>, %arg4: memref<256x256xbf16, #tpu.memory_space<vmem>>, %arg5: memref<1x256xf32, #tpu.memory_space<vmem>>, %arg6: memref<256x128xbf16, #tpu.memory_space<vmem>>, %arg7: memref<1x128xf32, #tpu.memory_space<vmem>>, %arg8: memref<128x512xbf16, #tpu.memory_space<vmem>>, %arg9: memref<1x512xf32, #tpu.memory_space<vmem>>, %arg10: memref<512x16xbf16, #tpu.memory_space<vmem>>, %arg11: memref<1x16xf32, #tpu.memory_space<vmem>>, %arg12: memref<16x128xf32, #tpu.memory_space<vmem>>) attributes {dimension_semantics = [#tpu.dimension_semantics<parallel>], iteration_bounds = array<i64: 1>, scalar_prefetch = 0 : i64, scratch_operands = 0 : i64, tpu.core_type = #tpu.core_type<tc>, window_params = [{transform_indices = @transform_0, window_bounds = array<i64: 128, 256>}, {pipeline_mode = #tpu.pipeline_mode<synchronous>, transform_indices = @transform_1, window_bounds = array<i64: 256, 256>}, {pipeline_mode = #tpu.pipeline_mode<synchronous>, transform_indices = @transform_2, window_bounds = array<i64: 1, 256>}, {pipeline_mode = #tpu.pipeline_mode<synchronous>, transform_indices = @transform_3, window_bounds = array<i64: 256, 256>}, {pipeline_mode = #tpu.pipeline_mode<synchronous>, transform_indices = @transform_4, window_bounds = array<i64: 1, 256>}, {pipeline_mode = #tpu.pipeline_mode<synchronous>, transform_indices = @transform_5, window_bounds = array<i64: 256, 128>}, {pipeline_mode = #tpu.pipeline_mode<synchronous>, transform_indices = @transform_6, window_bounds = array<i64: 1, 128>}, {pipeline_mode = #tpu.pipeline_mode<synchronous>, transform_indices = @transform_7, window_bounds = array<i64: 128, 512>}, {pipeline_mode = #tpu.pipeline_mode<synchronous>, transform_indices = @transform_8, window_bounds = array<i64: 1, 512>}, {pipeline_mode = #tpu.pipeline_mode<synchronous>, transform_indices = @transform_9, window_bounds = array<i64: 512, 16>}, {pipeline_mode = #tpu.pipeline_mode<synchronous>, transform_indices = @transform_10, window_bounds = array<i64: 1, 16>}, {transform_indices = @transform_11, window_bounds = array<i64: 16, 128>}]} {
    %c0 = arith.constant 0 : index
    %c0_0 = arith.constant 0 : index
    %0 = vector.load %arg1[%c0, %c0_0] : memref<128x256xbf16, #tpu.memory_space<vmem>>, vector<128x256xbf16>
    %c0_1 = arith.constant 0 : index
    %c0_2 = arith.constant 0 : index
    %1 = vector.load %arg2[%c0_1, %c0_2] : memref<256x256xbf16, #tpu.memory_space<vmem>>, vector<256x256xbf16>
    %cst = arith.constant dense<0.000000e+00> : vector<128x256xf32>
    %2 = tpu.matmul %0, %1, %cst {dimension_numbers = #tpu.dot_dimension_numbers<[1], [0], [0], [1], [0, 0, 1, 1], [], []>} : vector<128x256xbf16>, vector<256x256xbf16>, vector<128x256xf32> -> vector<128x256xf32>
    %c0_3 = arith.constant 0 : index
    %c0_4 = arith.constant 0 : index
    %3 = vector.load %arg3[%c0_3, %c0_4] : memref<1x256xf32, #tpu.memory_space<vmem>>, vector<1x256xf32>
    %4 = vector.broadcast %3 : vector<1x256xf32> to vector<128x256xf32>
    %5 = arith.addf %2, %4 : vector<128x256xf32>
    %cst_5 = arith.constant 0.000000e+00 : f32
    %6 = vector.broadcast %cst_5 : f32 to vector<128x256xf32>
    %7 = arith.maximumf %5, %6 : vector<128x256xf32>
    %8 = arith.truncf %7 : vector<128x256xf32> to vector<128x256xbf16>
    %c0_6 = arith.constant 0 : index
    %c0_7 = arith.constant 0 : index
    %9 = vector.load %arg4[%c0_6, %c0_7] : memref<256x256xbf16, #tpu.memory_space<vmem>>, vector<256x256xbf16>
    %cst_8 = arith.constant dense<0.000000e+00> : vector<128x256xf32>
    %10 = tpu.matmul %8, %9, %cst_8 {dimension_numbers = #tpu.dot_dimension_numbers<[1], [0], [0], [1], [0, 0, 1, 1], [], []>} : vector<128x256xbf16>, vector<256x256xbf16>, vector<128x256xf32> -> vector<128x256xf32>
    %c0_9 = arith.constant 0 : index
    %c0_10 = arith.constant 0 : index
    %11 = vector.load %arg5[%c0_9, %c0_10] : memref<1x256xf32, #tpu.memory_space<vmem>>, vector<1x256xf32>
    %12 = vector.broadcast %11 : vector<1x256xf32> to vector<128x256xf32>
    %13 = arith.addf %10, %12 : vector<128x256xf32>
    %cst_11 = arith.constant 0.000000e+00 : f32
    %14 = vector.broadcast %cst_11 : f32 to vector<128x256xf32>
    %15 = arith.maximumf %13, %14 : vector<128x256xf32>
    %16 = arith.truncf %15 : vector<128x256xf32> to vector<128x256xbf16>
    %c0_12 = arith.constant 0 : index
    %c0_13 = arith.constant 0 : index
    %17 = vector.load %arg6[%c0_12, %c0_13] : memref<256x128xbf16, #tpu.memory_space<vmem>>, vector<256x128xbf16>
    %cst_14 = arith.constant dense<0.000000e+00> : vector<128x128xf32>
    %18 = tpu.matmul %16, %17, %cst_14 {dimension_numbers = #tpu.dot_dimension_numbers<[1], [0], [0], [1], [0, 0, 1, 1], [], []>} : vector<128x256xbf16>, vector<256x128xbf16>, vector<128x128xf32> -> vector<128x128xf32>
    %c0_15 = arith.constant 0 : index
    %c0_16 = arith.constant 0 : index
    %19 = vector.load %arg7[%c0_15, %c0_16] : memref<1x128xf32, #tpu.memory_space<vmem>>, vector<1x128xf32>
    %20 = vector.broadcast %19 : vector<1x128xf32> to vector<128x128xf32>
    %21 = arith.addf %18, %20 : vector<128x128xf32>
    %cst_17 = arith.constant 0.000000e+00 : f32
    %22 = vector.broadcast %cst_17 : f32 to vector<128x128xf32>
    %23 = arith.maximumf %21, %22 : vector<128x128xf32>
    %24 = arith.truncf %23 : vector<128x128xf32> to vector<128x128xbf16>
    %c0_18 = arith.constant 0 : index
    %c0_19 = arith.constant 0 : index
    %25 = vector.load %arg8[%c0_18, %c0_19] : memref<128x512xbf16, #tpu.memory_space<vmem>>, vector<128x512xbf16>
    %cst_20 = arith.constant dense<0.000000e+00> : vector<128x512xf32>
    %26 = tpu.matmul %24, %25, %cst_20 {dimension_numbers = #tpu.dot_dimension_numbers<[1], [0], [0], [1], [0, 0, 1, 1], [], []>} : vector<128x128xbf16>, vector<128x512xbf16>, vector<128x512xf32> -> vector<128x512xf32>
    %c0_21 = arith.constant 0 : index
    %c0_22 = arith.constant 0 : index
    %27 = vector.load %arg9[%c0_21, %c0_22] : memref<1x512xf32, #tpu.memory_space<vmem>>, vector<1x512xf32>
    %28 = vector.broadcast %27 : vector<1x512xf32> to vector<128x512xf32>
    %29 = arith.addf %26, %28 : vector<128x512xf32>
    %cst_23 = arith.constant 0.000000e+00 : f32
    %30 = vector.broadcast %cst_23 : f32 to vector<128x512xf32>
    %31 = arith.maximumf %29, %30 : vector<128x512xf32>
    %32 = arith.truncf %31 : vector<128x512xf32> to vector<128x512xbf16>
    %c0_24 = arith.constant 0 : index
    %c0_25 = arith.constant 0 : index
    %33 = vector.load %arg10[%c0_24, %c0_25] : memref<512x16xbf16, #tpu.memory_space<vmem>>, vector<512x16xbf16>
    %cst_26 = arith.constant dense<0.000000e+00> : vector<128x16xf32>
    %34 = tpu.matmul %32, %33, %cst_26 {dimension_numbers = #tpu.dot_dimension_numbers<[1], [0], [0], [1], [0, 0, 1, 1], [], []>} : vector<128x512xbf16>, vector<512x16xbf16>, vector<128x16xf32> -> vector<128x16xf32>
    %c0_27 = arith.constant 0 : index
    %c0_28 = arith.constant 0 : index
    %35 = vector.load %arg11[%c0_27, %c0_28] : memref<1x16xf32, #tpu.memory_space<vmem>>, vector<1x16xf32>
    %36 = vector.broadcast %35 : vector<1x16xf32> to vector<128x16xf32>
    %37 = arith.addf %34, %36 : vector<128x16xf32>
    %38 = tpu.transpose %37, [1, 0] : vector<128x16xf32> -> vector<16x128xf32>
    %c0_29 = arith.constant 0 : index
    %c0_30 = arith.constant 0 : index
    %39 = vector.load %arg12[%c0_29, %c0_30] : memref<16x128xf32, #tpu.memory_space<vmem>>, vector<16x128xf32>
    tpu.vector_store %arg12[%c0_29, %c0_30], %38 {strides = array<i32>} : memref<16x128xf32, #tpu.memory_space<vmem>>, vector<16x128xf32>,
    return
  }
  func.func @transform_0(%arg0: i32) -> (i32, i32) {
    %c0_i32 = arith.constant 0 : i32
    %c0_i32_0 = arith.constant 0 : i32
    return %arg0, %c0_i32 : i32, i32
  }
  func.func @transform_1(%arg0: i32) -> (i32, i32) {
    %c0_i32 = arith.constant 0 : i32
    %c0_i32_0 = arith.constant 0 : i32
    %c0_i32_1 = arith.constant 0 : i32
    return %c0_i32, %c0_i32_0 : i32, i32
  }
  func.func @transform_2(%arg0: i32) -> (i32, i32) {
    %c0_i32 = arith.constant 0 : i32
    %c0_i32_0 = arith.constant 0 : i32
    %c0_i32_1 = arith.constant 0 : i32
    return %c0_i32, %c0_i32_0 : i32, i32
  }
  func.func @transform_3(%arg0: i32) -> (i32, i32) {
    %c0_i32 = arith.constant 0 : i32
    %c0_i32_0 = arith.constant 0 : i32
    %c0_i32_1 = arith.constant 0 : i32
    return %c0_i32, %c0_i32_0 : i32, i32
  }
  func.func @transform_4(%arg0: i32) -> (i32, i32) {
    %c0_i32 = arith.constant 0 : i32
    %c0_i32_0 = arith.constant 0 : i32
    %c0_i32_1 = arith.constant 0 : i32
    return %c0_i32, %c0_i32_0 : i32, i32
  }
  func.func @transform_5(%arg0: i32) -> (i32, i32) {
    %c0_i32 = arith.constant 0 : i32
    %c0_i32_0 = arith.constant 0 : i32
    %c0_i32_1 = arith.constant 0 : i32
    return %c0_i32, %c0_i32_0 : i32, i32
  }
  func.func @transform_6(%arg0: i32) -> (i32, i32) {
    %c0_i32 = arith.constant 0 : i32
    %c0_i32_0 = arith.constant 0 : i32
    %c0_i32_1 = arith.constant 0 : i32
    return %c0_i32, %c0_i32_0 : i32, i32
  }
  func.func @transform_7(%arg0: i32) -> (i32, i32) {
    %c0_i32 = arith.constant 0 : i32
    %c0_i32_0 = arith.constant 0 : i32
    %c0_i32_1 = arith.constant 0 : i32
    return %c0_i32, %c0_i32_0 : i32, i32
  }
  func.func @transform_8(%arg0: i32) -> (i32, i32) {
    %c0_i32 = arith.constant 0 : i32
    %c0_i32_0 = arith.constant 0 : i32
    %c0_i32_1 = arith.constant 0 : i32
    return %c0_i32, %c0_i32_0 : i32, i32
  }
  func.func @transform_9(%arg0: i32) -> (i32, i32) {
    %c0_i32 = arith.constant 0 : i32
    %c0_i32_0 = arith.constant 0 : i32
    %c0_i32_1 = arith.constant 0 : i32
    return %c0_i32, %c0_i32_0 : i32, i32
  }
  func.func @transform_10(%arg0: i32) -> (i32, i32) {
    %c0_i32 = arith.constant 0 : i32
    %c0_i32_0 = arith.constant 0 : i32
    %c0_i32_1 = arith.constant 0 : i32
    return %c0_i32, %c0_i32_0 : i32, i32
  }
  func.func @transform_11(%arg0: i32) -> (i32, i32) {
    %c0_i32 = arith.constant 0 : i32
    %c0_i32_0 = arith.constant 0 : i32
    return %c0_i32, %arg0 : i32, i32
  }
}

</mosaic_0001>

<bundles_post_ra>
// kernel: cnn_encoder_forward.1
= control target key start
LH: loop header
LB: loop body
LE: loop exit
PB: predicated region body
PF: predicated region fallthrough
CT: control target
= control target key end

     0   :  { %16 = vsyncpa [#allocation3], 0  ;;  %s4248_s0 = inlined_call_operand.vmem [shape: bf16[2,256], index: 0, kind: input, shape index: {}]   ;;  %s4249_s1 = inlined_call_operand.vmem [shape: bf16[256,256], index: 1, kind: input, shape index: {}]   ;;  %s4250_s2 = inlined_call_operand.vmem [shape: f32[1,256], index: 2, kind: input, shape index: {}]   ;;  %s4251_s3 = inlined_call_operand.hbm [shape: bf16[256,256], index: 3, kind: input, shape index: {}]   ;;  %s4252_s4 = inlined_call_operand.vmem [shape: f32[1,256], index: 4, kind: input, shape index: {}]   ;;  %s4253_s5 = inlined_call_operand.hbm [shape: bf16[256,128], index: 5, kind: input, shape index: {}]   ;;  %s4254_s6 = inlined_call_operand.vmem [shape: f32[1,128], index: 6, kind: input, shape index: {}]   ;;  %s4255_s7 = inlined_call_operand.hbm [shape: bf16[128,512], index: 7, kind: input, shape index: {}]   ;;  %s4256_s8 = inlined_call_operand.vmem [shape: f32[1,512], index: 8, kind: input, shape index: {}]   ;;  %s4257_s9 = inlined_call_operand.vmem [shape: bf16[512,16], index: 9, kind: input, shape index: {}]   ;;  %s4258_s10 = inlined_call_operand.vmem [shape: f32[1,16], index: 10, kind: input, shape index: {}]   ;;  %s4259_s11 = inlined_call_operand.vmem [shape: f32[16,128], index: 11, kind: output, shape index: {}]  }
   0x1   :  { %17 = vsyncpa [#allocation5], 0  ;;  %s3392_s17 = smov [#allocation4]  }
   0x2   :  { %s43_s18 = sshll.u32 %s3392_s17, 4  ;;  %s44_s18 = int_to_ptr.vmem [resolvable:$true] %s43_s18 }
   0x3   :  { %s3336_s19 = scalar_lea.vmem %s44_s18, 2048  ;;  %p3341_p1 = scmp.lt.s32.totalorder %s44_s18, %s44_s18 }
   0x4   :  { %p3337_p0 = scmp.ne.s32.totalorder %s44_s18, %s3336_s19  ;;  %p3342_p2 = scmp.lt.s32.totalorder %s3336_s19, %s3336_s19 }
   0x6   :  { %p3343_p3 = por %p3342_p2, %p3341_p1 }
   0x8   :  { %p3344_p4 = pnand %p3343_p3, %p3337_p0 }
   0xa   :  { %3347 = shalt.err (!%p3344_p4)
}
   0xb   :  { %s3393_s20 = smov 64   ;;  %s3394_s21 = smov 4  }
   0xc   :  { %49 = dma.hbm_to_vmem [thread:$0]  %s4253_s5, 2048, %s44_s18, [#allocation5], %s3393_s20, %s3393_s20, %s3394_s21  }
   0xd   :  { %s3395_s24 = smov [#allocation2]  }
   0xe   :  { %s29_s25 = sshll.u32 %s3395_s24, 4  ;;  %s30_s25 = int_to_ptr.vmem [resolvable:$true] %s29_s25 }
   0xf   :  { %s3356_s26 = scalar_lea.vmem %s30_s25, 4096  ;;  %p3361_p6 = scmp.lt.s32.totalorder %s30_s25, %s30_s25 }
  0x10   :  { %p3357_p5 = scmp.ne.s32.totalorder %s30_s25, %s3356_s26  ;;  %p3362_p7 = scmp.lt.s32.totalorder %s3356_s26, %s3356_s26 }
  0x12   :  { %p3363_p8 = por %p3362_p7, %p3361_p6 }
  0x14   :  { %p3364_p9 = pnand %p3363_p8, %p3357_p5 }
  0x16   :  { %3367 = shalt.err (!%p3364_p9)
}
  0x17   :  { %s3396_s27 = smov 128   ;;  %s3397_s28 = smov 8  }
  0x18   :  { %35 = dma.hbm_to_vmem [thread:$0]  %s4251_s3, 4096, %s30_s25, [#allocation3], %s3396_s27, %s3396_s27, %s3397_s28  }
  0x19   :  { %s3398_s12 = smov [#allocation6]  }
  0x1a   :  { %s57_s13 = sshll.u32 %s3398_s12, 4  ;;  %s58_s13 = int_to_ptr.vmem [resolvable:$true] %s57_s13 }
  0x1b   :  { %s3376_s5 = scalar_lea.vmem %s58_s13, 4096  ;;  %p3381_p11 = scmp.lt.s32.totalorder %s58_s13, %s58_s13 }
  0x1c   :  { %p3377_p10 = scmp.ne.s32.totalorder %s58_s13, %s3376_s5  ;;  %p3382_p12 = scmp.lt.s32.totalorder %s3376_s5, %s3376_s5 }
  0x1e   :  { %p3383_p13 = por %p3382_p12, %p3381_p11 }
  0x20   :  { %p3384_p0 = pnand %p3383_p13, %p3377_p10 }
  0x22   :  { %3387 = shalt.err (!%p3384_p0)
}
  0x23   :  { %s3399_s14 = smov 256   ;;  %s3400_s15 = smov 16  }
  0x24   :  { %63 = dma.hbm_to_vmem [thread:$0]  %s4255_s7, 4096, %s58_s13, [#allocation5], %s3399_s14, %s3399_s14, %s3400_s15  }
  0x25   :  { %3388 = dma.done.wait [#allocation3], 4096  }
  0x26   :  { %3389 = vsyncadd [#allocation3], 4294963200 }
  0x27   :  { %3390 = dma.done.wait [#allocation5], 6144  }
  0x28   :  { %3391 = vsyncadd [#allocation5], 4294961152  ;;  %v3136_v0 = vld [vmem:[%s4249_s1 + $0x74] ss:$8 sps:$4 sm:$0xff]   ;;  %v3138_v1 = vld [vmem:[%s4249_s1 + $0x70] ss:$8 sps:$4 sm:$0xff]   ;;  %v178_v9 = vlaneseq }
  0x29   :  { %956 = vmatprep.subr.bf16.mxu0 %v3136_v0  ;;  %v3139_v2 = vld [vmem:[%s4249_s1 + $0x64] ss:$8 sps:$4 sm:$0xff]   ;;  %v3141_v3 = vld [vmem:[%s4249_s1 + $0x60] ss:$8 sps:$4 sm:$0xff]   ;;  %v3142_v4 = vld [vmem:[%s4249_s1 + $0x54] ss:$8 sps:$4 sm:$0xff]  }
  0x2a   :  { %957 = vmatpush1.bf16.msra.mxu0 %v3138_v1  ;;  %v3144_v5 = vld [vmem:[%s4249_s1 + $0x50] ss:$8 sps:$4 sm:$0xff]   ;;  %v3145_v6 = vld [vmem:[%s4249_s1 + $0x44] ss:$8 sps:$4 sm:$0xff]   ;;  %v3147_v7 = vld [vmem:[%s4249_s1 + $0x40] ss:$8 sps:$4 sm:$0xff]  }
  0x2b   :  { %958 = vmatprep.subr.bf16.mxu0 %v3139_v2  ;;  %v3148_v8 = vld [vmem:[%s4249_s1 + $0x34] ss:$8 sps:$4 sm:$0xff]   ;;  %v3401_v10 = vmov 1966171168   ;;  %v3150_v12 = vld [vmem:[%s4249_s1 + $0x30] ss:$8 sps:$4 sm:$0xff]  }
  0x2c   :  { %v257_v11 = vunpack.c.l.s4 %v3401_v10  ;;  %v3151_v13 = vld [vmem:[%s4249_s1 + $0x24] ss:$8 sps:$4 sm:$0xff]   ;;  %v3505_v14 = vshrl.u32 %v178_v9, 7  ;;  %v3153_v16 = vld [vmem:[%s4249_s1 + $0x20] ss:$8 sps:$4 sm:$0xff]  }
  0x2d   :  { %v3154_v17 = vld [vmem:[%s4249_s1 + $0x14] ss:$8 sps:$4 sm:$0xff]   ;;  %v3156_v19 = vld [vmem:[%s4249_s1 + $0x10] ss:$8 sps:$4 sm:$0xff]   ;;  %v80_v20 = vld [vmem:[%s4248_s0] sm:$0x3] }
  0x2e   :  { %959 = vmatpush1.bf16.msra.mxu0 %v3141_v3  ;;  %v258_v15 = vunpack.c.0.s8 %v257_v11  ;;  %v81_v21 = vld [vmem:[%s4248_s0 + $0x2] sm:$0x3]  ;;  %v82_v22 = vld [vmem:[%s4248_s0 + $0x4] sm:$0x3]  ;;  %v83_v23 = vld [vmem:[%s4248_s0 + $0x6] sm:$0x3] }
  0x2f   :  { %960 = vmatprep.subr.bf16.mxu0 %v3142_v4  ;;  %v84_v24 = vld [vmem:[%s4248_s0 + $0x8] sm:$0x3]  ;;  %v252_v25 = vcombine.low %v80_v20, %v81_v21  ;;  %v85_v26 = vld [vmem:[%s4248_s0 + $0xa] sm:$0x3]  ;;  %v86_v27 = vld [vmem:[%s4248_s0 + $0xc] sm:$0x3]  ;;  %v253_v29 = vcombine.low %v82_v22, %v83_v23 }
  0x30   :  { %v3514_v18 = vsub.s32 %v258_v15, %v3505_v14  ;;  %v87_v28 = vld [vmem:[%s4248_s0 + $0xe] sm:$0x3]  ;;  %v254_v31 = vcombine.low %v84_v24, %v85_v26  ;;  %v3159_v37 = vld [vmem:[%s4249_s1] ss:$8 sps:$4 sm:$0xff]   ;;  %v3160_v39 = vld [vmem:[%s4249_s1 + $0xf4] ss:$8 sps:$4 sm:$0xff]  }
  0x31   :  { %v3157_v30 = vld [vmem:[%s4249_s1 + $0x4] ss:$8 sps:$4 sm:$0xff]   ;;  %v255_v32 = vcombine.low %v86_v27, %v87_v28  ;;  %v3162_v43 = vld [vmem:[%s4249_s1 + $0xf0] ss:$8 sps:$4 sm:$0xff]   ;;  %v3165_v46 = vld [vmem:[%s4249_s1 + $0xe0] ss:$8 sps:$4 sm:$0xff]  }
  0x32   :  { %961 = vmatpush1.bf16.msra.mxu0 %v3144_v5  ;;  %v3547_v33 = vrot.slane %v252_v25, %v3514_v18  ;;  %v3550_v34 = vrot.slane %v253_v29, %v3514_v18  ;;  %v3553_v35 = vrot.slane %v254_v31, %v3514_v18  ;;  %v3163_v44 = vld [vmem:[%s4249_s1 + $0xe4] ss:$8 sps:$4 sm:$0xff]   ;;  %v3166_v47 = vld [vmem:[%s4249_s1 + $0xd4] ss:$8 sps:$4 sm:$0xff]   ;;  %v3168_v48 = vld [vmem:[%s4249_s1 + $0xd0] ss:$8 sps:$4 sm:$0xff]  }
  0x33   :  { %962 = vmatprep.subr.bf16.mxu0 %v3145_v6  ;;  %v3556_v36 = vrot.slane %v255_v32, %v3514_v18  ;;  %v3169_v49 = vld [vmem:[%s4249_s1 + $0xc4] ss:$8 sps:$4 sm:$0xff]   ;;  %v3171_v50 = vld [vmem:[%s4249_s1 + $0xc0] ss:$8 sps:$4 sm:$0xff]   ;;  %v88_v51 = vld [vmem:[%s4248_s0 + $0x10] sm:$0x3] }
  0x34   :  { %v285_v38 = vcombine.high %v3547_v33, %v3550_v34  ;;  %v89_v52 = vld [vmem:[%s4248_s0 + $0x12] sm:$0x3]  ;;  %v90_v53 = vld [vmem:[%s4248_s0 + $0x14] sm:$0x3]  ;;  %v91_v54 = vld [vmem:[%s4248_s0 + $0x16] sm:$0x3]  ;;  %v284_v25 = vcombine.low %v3547_v33, %v3550_v34 }
  0x35   :  { %v287_v40 = vcombine.high %v3553_v35, %v3556_v36  ;;  %v92_v55 = vld [vmem:[%s4248_s0 + $0x18] sm:$0x3]  ;;  %v93_v56 = vld [vmem:[%s4248_s0 + $0x1a] sm:$0x3]  ;;  %v94_v57 = vld [vmem:[%s4248_s0 + $0x1c] sm:$0x3]  ;;  %v318_v63 = vcombine.low %v88_v51, %v89_v52  ;;  %v319_v0 = vcombine.low %v90_v53, %v91_v54  ;;  %v286_v26 = vcombine.low %v3553_v35, %v3556_v36 }
  0x36   :  { %963 = vmatpush1.bf16.msra.mxu0 %v3147_v7  ;;  %v301_v41 = vrot.slane %v285_v38, %v3514_v18  ;;  %v95_v58 = vld [vmem:[%s4248_s0 + $0x1e] sm:$0x3]  ;;  %v3186_v60 = vld [vmem:[#allocation2 + $0x70] ss:$8 sps:$4 sm:$0xff]   ;;  %v3187_v62 = vld [vmem:[#allocation2 + $0x64] ss:$8 sps:$4 sm:$0xff]   ;;  %v320_v1 = vcombine.low %v92_v55, %v93_v56 }
  0x37   :  { %964 = vmatprep.subr.bf16.mxu0 %v3148_v8  ;;  %v315_v42 = vrot.slane %v287_v40, %v3514_v18  ;;  %v3184_v59 = vld [vmem:[#allocation2 + $0x74] ss:$8 sps:$4 sm:$0xff]   ;;  %v321_v2 = vcombine.low %v94_v57, %v95_v58  ;;  %v3189_v3 = vld [vmem:[#allocation2 + $0x60] ss:$8 sps:$4 sm:$0xff]   ;;  %v3174_v4 = vld [vmem:[%s4249_s1 + $0xb0] ss:$8 sps:$4 sm:$0xff]   ;;  %v3631_v9 = vrot.slane %v318_v63, %v3514_v18  ;;  %v3634_v10 = vrot.slane %v319_v0, %v3514_v18 }
  0x38   :  { %v3172_v61 = vld [vmem:[%s4249_s1 + $0xb4] ss:$8 sps:$4 sm:$0xff]   ;;  %1321 = vmatprep.subr.bf16.mxu1 %v3184_v59  ;;  %v3175_v5 = vld [vmem:[%s4249_s1 + $0xa4] ss:$8 sps:$4 sm:$0xff]   ;;  %v3177_v6 = vld [vmem:[%s4249_s1 + $0xa0] ss:$8 sps:$4 sm:$0xff]   ;;  %v3637_v11 = vrot.slane %v320_v1, %v3514_v18 }
  0x39   :  { %v317_v45 = vcombine.low %v301_v41, %v315_v42  ;;  %1322 = vmatpush1.bf16.msra.mxu1 %v3186_v60  ;;  %v3190_v7 = vld [vmem:[#allocation2 + $0x54] ss:$8 sps:$4 sm:$0xff]   ;;  %v97_v15 = vld [vmem:[%s4248_s0 + $0x22] sm:$0x3]  ;;  %v101_v20 = vld [vmem:[%s4248_s0 + $0x2a] sm:$0x3]  ;;  %v351_v27 = vcombine.high %v3631_v9, %v3634_v10  ;;  %v350_v57 = vcombine.low %v3631_v9, %v3634_v10 }
  0x3a   :  { %965 = vmatpush1.bf16.msra.mxu0 %v3150_v12  ;;  %1323 = vmatprep.subr.bf16.mxu1 %v3187_v62  ;;  %v3178_v8 = vld [vmem:[%s4249_s1 + $0x94] ss:$8 sps:$4 sm:$0xff]   ;;  %v3640_v12 = vrot.slane %v321_v2, %v3514_v18  ;;  %v3192_v21 = vld [vmem:[#allocation2 + $0x50] ss:$8 sps:$4 sm:$0xff]   ;;  %v102_v22 = vld [vmem:[%s4248_s0 + $0x2c] sm:$0x3] }
  0x3b   :  { %966 = vmatprep.subr.bf16.mxu0 %v3151_v13  ;;  %988 = vmatprep.mubr.bf16.mxu0 %v317_v45  ;;  %v96_v13 = vld [vmem:[%s4248_s0 + $0x20] sm:$0x3]  ;;  %v103_v23 = vld [vmem:[%s4248_s0 + $0x2e] sm:$0x3]  ;;  %v104_v36 = vld [vmem:[%s4248_s0 + $0x30] sm:$0x3]  ;;  %v308_v45 = vrot.slane %v286_v26, %v3514_v18 }
  0x3c   :  { %v3193_v24 = vld [vmem:[#allocation2 + $0x44] ss:$8 sps:$4 sm:$0xff]   ;;  %v353_v28 = vcombine.high %v3637_v11, %v3640_v12  ;;  %v3195_v29 = vld [vmem:[#allocation2 + $0x40] ss:$8 sps:$4 sm:$0xff]   ;;  %v384_v32 = vcombine.low %v96_v13, %v97_v15  ;;  %v387_v35 = vcombine.low %v102_v22, %v103_v23  ;;  %v3196_v38 = vld [vmem:[#allocation2 + $0x34] ss:$8 sps:$4 sm:$0xff]   ;;  %v352_v58 = vcombine.low %v3637_v11, %v3640_v12 }
  0x3d   :  { %1324 = vmatpush1.bf16.msra.mxu1 %v3189_v3  ;;  %v3181_v31 = vld [vmem:[%s4249_s1 + $0x84] ss:$8 sps:$4 sm:$0xff]   ;;  %v106_v40 = vld [vmem:[%s4248_s0 + $0x34] sm:$0x3]  ;;  %v107_v41 = vld [vmem:[%s4248_s0 + $0x36] sm:$0x3] }
  0x3e   :  { %967 = vmatpush1.bf16.msra.mxu0 %v3153_v16  ;;  %v98_v16 = vld [vmem:[%s4248_s0 + $0x24] sm:$0x3]  ;;  %1325 = vmatprep.subr.bf16.mxu1 %v3190_v7  ;;  %v108_v42 = vld [vmem:[%s4248_s0 + $0x38] sm:$0x3]  ;;  %v415_v53 = vrot.slane %v387_v35, %v3514_v18  ;;  %v111_v54 = vld [vmem:[%s4248_s0 + $0x3e] sm:$0x3]  ;;  %v451_v62 = vcombine.low %v106_v40, %v107_v41 }
  0x3f   :  { %968 = vmatprep.subr.bf16.mxu0 %v3154_v17  ;;  %v99_v17 = vld [vmem:[%s4248_s0 + $0x26] sm:$0x3]  ;;  %v3201_v56 = vld [vmem:[#allocation2 + $0x20] ss:$8 sps:$4 sm:$0xff]   ;;  %v3202_v60 = vld [vmem:[#allocation2 + $0x14] ss:$8 sps:$4 sm:$0xff]  }
  0x40   :  { %v385_v33 = vcombine.low %v98_v16, %v99_v17  ;;  %v3199_v55 = vld [vmem:[#allocation2 + $0x24] ss:$8 sps:$4 sm:$0xff]   ;;  %v113_v9 = vld [vmem:[%s4248_s0 + $0x42] sm:$0x3]  ;;  %v3734_v11 = vrot.slane %v451_v62, %v3514_v18  ;;  %v116_v17 = vld [vmem:[%s4248_s0 + $0x48] sm:$0x3] }
  0x41   :  { %1326 = vmatpush1.bf16.msra.mxu1 %v3192_v21  ;;  %v3205_v10 = vld [vmem:[#allocation2 + $0x4] ss:$8 sps:$4 sm:$0xff]   ;;  %v122_v41 = vld [vmem:[%s4248_s0 + $0x54] sm:$0x3] }
  0x42   :  { %969 = vmatpush1.bf16.msra.mxu0 %v3156_v19  ;;  %v100_v19 = vld [vmem:[%s4248_s0 + $0x28] sm:$0x3]  ;;  %1327 = vmatprep.subr.bf16.mxu1 %v3193_v24  ;;  %v401_v51 = vrot.slane %v385_v33, %v3514_v18  ;;  %v114_v15 = vld [vmem:[%s4248_s0 + $0x44] sm:$0x3]  ;;  %v115_v16 = vld [vmem:[%s4248_s0 + $0x46] sm:$0x3] }
  0x43   :  { %970 = vmatprep.subr.bf16.mxu0 %v3157_v30  ;;  %v3180_v30 = vld [vmem:[%s4249_s1 + $0x90] ss:$8 sps:$4 sm:$0xff]   ;;  %v386_v34 = vcombine.low %v100_v19, %v101_v20  ;;  %v117_v19 = vld [vmem:[%s4248_s0 + $0x4a] sm:$0x3]  ;;  %v118_v20 = vld [vmem:[%s4248_s0 + $0x4c] sm:$0x3]  ;;  %v517_v33 = vcombine.low %v114_v15, %v115_v16 }
  0x44   :  { %v119_v21 = vld [vmem:[%s4248_s0 + $0x4e] sm:$0x3]  ;;  %v3207_v24 = vld [vmem:[#allocation2] ss:$8 sps:$4 sm:$0xff]  }
  0x45   :  { %1328 = vmatpush1.bf16.msra.mxu1 %v3195_v29  ;;  %v408_v52 = vrot.slane %v386_v34, %v3514_v18  ;;  %v518_v34 = vcombine.low %v116_v17, %v117_v19  ;;  %v519_v35 = vcombine.low %v118_v20, %v119_v21  ;;  %v132_v15 = vld [vmem:[%s4248_s0 + $0x68] sm:$0x3]  ;;  %v133_v16 = vld [vmem:[%s4248_s0 + $0x6a] sm:$0x3]  ;;  %v134_v17 = vld [vmem:[%s4248_s0 + $0x6c] sm:$0x3] }
  0x46   :  { %971 = vmatpush1.bf16.msra.mxu0 %v3159_v37  ;;  %v105_v37 = vld [vmem:[%s4248_s0 + $0x32] sm:$0x3]  ;;  %1329 = vmatprep.subr.bf16.mxu1 %v3196_v38  ;;  %v135_v19 = vld [vmem:[%s4248_s0 + $0x6e] sm:$0x3] }
  0x47   :  { %972 = vmatprep.subr.bf16.mxu0 %v3160_v39  ;;  %v3183_v39 = vld [vmem:[%s4249_s1 + $0x80] ss:$8 sps:$4 sm:$0xff]   ;;  %v450_v59 = vcombine.low %v104_v36, %v105_v37  ;;  %v419_v3 = vcombine.high %v408_v52, %v415_v53  ;;  %v418_v26 = vcombine.low %v408_v52, %v415_v53  ;;  %v120_v36 = vld [vmem:[%s4248_s0 + $0x50] sm:$0x3]  ;;  %v121_v37 = vld [vmem:[%s4248_s0 + $0x52] sm:$0x3]  ;;  %v540_v52 = vrot.slane %v518_v34, %v3514_v18 }
  0x48   :  { %v3210_v38 = vld [vmem:[#allocation2 + $0xf0] ss:$8 sps:$4 sm:$0xff]   ;;  %v547_v53 = vrot.slane %v519_v35, %v3514_v18 }
  0x49   :  { %v3725_v7 = vrot.slane %v450_v59, %v3514_v18  ;;  %v447_v23 = vrot.slane %v419_v3, %v3514_v18  ;;  %v440_v40 = vrot.slane %v418_v26, %v3514_v18  ;;  %v3222_v34 = vld [vmem:[#allocation2 + $0xb0] ss:$8 sps:$4 sm:$0xff]  }
  0x4a   :  { %973 = vmatpush2.bf16.msra.mxu0 %v3162_v43  ;;  %v109_v43 = vld [vmem:[%s4248_s0 + $0x3a] sm:$0x3] }
  0x4b   :  { %974 = vmatprep.subr.bf16.mxu0 %v3163_v44  ;;  %v294_v44 = vrot.slane %v284_v25, %v3514_v18  ;;  %v452_v63 = vcombine.low %v108_v42, %v109_v43  ;;  %v483_v29 = vcombine.high %v3725_v7, %v3734_v11  ;;  %v123_v42 = vld [vmem:[%s4248_s0 + $0x56] sm:$0x3]  ;;  %v124_v43 = vld [vmem:[%s4248_s0 + $0x58] sm:$0x3] }
  0x4d   :  { %v3737_v12 = vrot.slane %v452_v63, %v3514_v18 }
  0x4e   :  { %975 = vmatpush2.bf16.msra.mxu0 %v3165_v46  ;;  %v367_v46 = vrot.slane %v351_v27, %v3514_v18  ;;  %v3208_v27 = vld [vmem:[#allocation2 + $0xf4] ss:$8 sps:$4 sm:$0xff]  }
  0x4f   :  { %976 = vmatprep.subr.bf16.mxu0 %v3166_v47  ;;  %v381_v47 = vrot.slane %v353_v28, %v3514_v18 }
  0x51   :  { %v383_v1 = vcombine.low %v367_v46, %v381_v47  ;;  %v127_v46 = vld [vmem:[%s4248_s0 + $0x5e] sm:$0x3]  ;;  %v3211_v47 = vld [vmem:[#allocation2 + $0xe4] ss:$8 sps:$4 sm:$0xff]  }
  0x52   :  { %977 = vmatpush2.bf16.msra.mxu0 %v3168_v48  ;;  %v110_v48 = vld [vmem:[%s4248_s0 + $0x3c] sm:$0x3] }
  0x53   :  { %978 = vmatprep.subr.bf16.mxu0 %v3169_v49  ;;  %v3198_v49 = vld [vmem:[#allocation2 + $0x30] ss:$8 sps:$4 sm:$0xff]   ;;  %v453_v0 = vcombine.low %v110_v48, %v111_v54  ;;  %v499_v48 = vrot.slane %v483_v29, %v3514_v18  ;;  %v3213_v54 = vld [vmem:[#allocation2 + $0xe0] ss:$8 sps:$4 sm:$0xff]  }
  0x54   :  { %1330 = vmatpush1.bf16.msra.mxu1 %v3198_v49 }
  0x55   :  { %1331 = vmatprep.subr.bf16.mxu1 %v3199_v55  ;;  %v3740_v13 = vrot.slane %v453_v0, %v3514_v18  ;;  %v482_v55 = vcombine.low %v3725_v7, %v3734_v11  ;;  %v129_v7 = vld [vmem:[%s4248_s0 + $0x62] sm:$0x3] }
  0x56   :  { %979 = vmatpush2.bf16.msra.mxu0 %v3171_v50  ;;  %v3709_v50 = vrot.slane %v384_v32, %v3514_v18 }
  0x57   :  { %980 = vmatprep.subr.bf16.mxu0 %v3172_v61  ;;  %v316_v61 = vcombine.low %v294_v44, %v308_v45  ;;  %v125_v44 = vld [vmem:[%s4248_s0 + $0x5a] sm:$0x3]  ;;  %v126_v45 = vld [vmem:[%s4248_s0 + $0x5c] sm:$0x3]  ;;  %v492_v3 = vrot.slane %v482_v55, %v3514_v18 }
  0x58   :  { %v417_v2 = vcombine.high %v3709_v50, %v401_v51  ;;  %1332 = vmatpush1.bf16.msra.mxu1 %v3201_v56  ;;  %v416_v25 = vcombine.low %v3709_v50, %v401_v51  ;;  %v533_v51 = vrot.slane %v517_v33, %v3514_v18  ;;  %v484_v56 = vcombine.low %v3737_v12, %v3740_v13 }
  0x59   :  { %1333 = vmatprep.subr.bf16.mxu1 %v3202_v60  ;;  %v583_v60 = vcombine.low %v122_v41, %v123_v42  ;;  %v585_v62 = vcombine.low %v126_v45, %v127_v46  ;;  %v651_v33 = vcombine.low %v134_v17, %v135_v19  ;;  %v141_v45 = vld [vmem:[%s4248_s0 + $0x7a] sm:$0x3]  ;;  %v142_v46 = vld [vmem:[%s4248_s0 + $0x7c] sm:$0x3] }
  0x5a   :  { %981 = vmatpush2.bf16.msra.mxu0 %v3174_v4  ;;  %v3204_v4 = vld [vmem:[#allocation2 + $0x10] ss:$8 sps:$4 sm:$0xff]   ;;  %v433_v22 = vrot.slane %v417_v2, %v3514_v18 }
  0x5b   :  { %982 = vmatprep.subr.bf16.mxu0 %v3175_v5  ;;  %v360_v5 = vrot.slane %v350_v57, %v3514_v18  ;;  %v582_v57 = vcombine.low %v120_v36, %v121_v37  ;;  %v3216_v2 = vld [vmem:[#allocation2 + $0xd0] ss:$8 sps:$4 sm:$0xff]   ;;  %v613_v11 = vrot.slane %v585_v62, %v3514_v18 }
  0x5c   :  { %1334 = vmatpush1.bf16.msra.mxu1 %v3204_v4  ;;  %v449_v32 = vcombine.low %v433_v22, %v447_v23  ;;  %v506_v4 = vrot.slane %v484_v56, %v3514_v18  ;;  %v3219_v22 = vld [vmem:[#allocation2 + $0xc0] ss:$8 sps:$4 sm:$0xff]   ;;  %v136_v37 = vld [vmem:[%s4248_s0 + $0x70] sm:$0x3] }
  0x5d   :  { %1335 = vmatprep.subr.bf16.mxu1 %v3205_v10 }
  0x5e   :  { %983 = vmatpush2.bf16.msra.mxu0 %v3177_v6  ;;  %v374_v6 = vrot.slane %v352_v58, %v3514_v18  ;;  %v3214_v58 = vld [vmem:[#allocation2 + $0xd4] ss:$8 sps:$4 sm:$0xff]   ;;  %v514_v26 = vcombine.low %v492_v3, %v506_v4 }
  0x5f   :  { %984 = vmatprep.subr.bf16.mxu0 %v3178_v8  ;;  %v112_v8 = vld [vmem:[%s4248_s0 + $0x40] sm:$0x3] }
  0x60   :  { %v382_v28 = vcombine.low %v360_v5, %v374_v6  ;;  %1336 = vmatpush1.bf16.msra.mxu1 %v3207_v24  ;;  %v3806_v5 = vrot.slane %v582_v57, %v3514_v18  ;;  %v128_v6 = vld [vmem:[%s4248_s0 + $0x60] sm:$0x3]  ;;  %v550_v24 = vcombine.low %v540_v52, %v547_v53 }
  0x61   :  { %1337 = vmatprep.subr.bf16.mxu1 %v3208_v27  ;;  %v648_v29 = vcombine.low %v128_v6, %v129_v7 }
  0x62   :  { %985 = vmatpush2.bf16.msra.mxu0 %v3180_v30  ;;  %v485_v30 = vcombine.high %v3737_v12, %v3740_v13  ;;  %v130_v12 = vld [vmem:[%s4248_s0 + $0x64] sm:$0x3]  ;;  %v131_v13 = vld [vmem:[%s4248_s0 + $0x66] sm:$0x3]  ;;  %v572_v36 = vrot.slane %v550_v24, %v3514_v18 }
  0x63   :  { %986 = vmatprep.subr.bf16.mxu0 %v3181_v31  ;;  %v516_v31 = vcombine.low %v112_v8, %v113_v9  ;;  %v3217_v8 = vld [vmem:[#allocation2 + $0xc4] ss:$8 sps:$4 sm:$0xff]   ;;  %v599_v9 = vrot.slane %v583_v60, %v3514_v18 }
  0x64   :  { %v513_v49 = vrot.slane %v485_v30, %v3514_v18  ;;  %1338 = vmatpush2.bf16.msra.mxu1 %v3210_v38  ;;  %v137_v38 = vld [vmem:[%s4248_s0 + $0x72] sm:$0x3]  ;;  %v3223_v24 = vld [vmem:[#allocation2 + $0xa4] ss:$8 sps:$4 sm:$0xff]  }
  0x65   :  { %v526_v50 = vrot.slane %v516_v31, %v3514_v18  ;;  %1339 = vmatprep.subr.bf16.mxu1 %v3211_v47  ;;  %v615_v27 = vcombine.high %v3806_v5, %v599_v9  ;;  %v649_v31 = vcombine.low %v130_v12, %v131_v13  ;;  %v143_v47 = vld [vmem:[%s4248_s0 + $0x7e] sm:$0x3]  ;;  %v714_v55 = vcombine.low %v136_v37, %v137_v38 }
  0x66   :  { %987 = vmatpush2.bf16.msra.mxu0 %v3183_v39  ;;  %v426_v39 = vrot.slane %v416_v25, %v3514_v18  ;;  %v515_v63 = vcombine.low %v499_v48, %v513_v49  ;;  %v3220_v25 = vld [vmem:[#allocation2 + $0xb4] ss:$8 sps:$4 sm:$0xff]   ;;  %v717_v60 = vcombine.low %v142_v46, %v143_v47 }
  0x67   :  { %v549_v0 = vcombine.high %v526_v50, %v533_v51  ;;  %v548_v23 = vcombine.low %v526_v50, %v533_v51  ;;  %v631_v41 = vrot.slane %v615_v27, %v3514_v18  ;;  %v665_v48 = vrot.slane %v649_v31, %v3514_v18  ;;  %v3228_v27 = vld [vmem:[#allocation2 + $0x90] ss:$8 sps:$4 sm:$0xff]  }
  0x68   :  { %v448_v59 = vcombine.low %v426_v39, %v440_v40  ;;  %1340 = vmatpush2.bf16.msra.mxu1 %v3213_v54  ;;  %v138_v39 = vld [vmem:[%s4248_s0 + $0x74] sm:$0x3]  ;;  %v139_v40 = vld [vmem:[%s4248_s0 + $0x76] sm:$0x3]  ;;  %v679_v50 = vrot.slane %v651_v33, %v3514_v18  ;;  %v614_v51 = vcombine.low %v3806_v5, %v599_v9  ;;  %v745_v4 = vrot.slane %v717_v60, %v3514_v18  ;;  %v3233_v31 = vld [vmem:[#allocation4 + $0x38] sm:$0xff]  }
  0x69   :  { %989 = vmatmul.mubr.bf16.vlgmr.msra.gmra.mxu0 %v316_v61  ;;  %v584_v61 = vcombine.low %v124_v43, %v125_v44  ;;  %v565_v20 = vrot.slane %v549_v0, %v3514_v18  ;;  %1341 = vmatprep.subr.bf16.mxu1 %v3214_v58  ;;  %v558_v35 = vrot.slane %v548_v23, %v3514_v18  ;;  %v140_v44 = vld [vmem:[%s4248_s0 + $0x78] sm:$0x3]  ;;  %v3236_v33 = vld [vmem:[#allocation4 + $0x68] sm:$0xff]  }
  0x6a   :  { %998 = vmatprep.mubr.bf16.mxu0 %v383_v1  ;;  %v551_v1 = vcombine.high %v540_v52, %v547_v53  ;;  %v658_v43 = vrot.slane %v648_v29, %v3514_v18  ;;  %v715_v56 = vcombine.low %v138_v39, %v139_v40  ;;  %v3231_v29 = vld [vmem:[#allocation2 + $0x80] ss:$8 sps:$4 sm:$0xff]   ;;  %v3893_v37 = vld [vmem:[#allocation4 + $0x58] sm:$0xff]   ;;  %v3899_v39 = vld [vmem:[#allocation4 + $0x50] sm:$0xff]  }
  0x6b   :  { %v606_v10 = vrot.slane %v584_v61, %v3514_v18  ;;  %v580_v53 = vcombine.low %v558_v35, %v572_v36  ;;  %v624_v61 = vrot.slane %v614_v51, %v3514_v18  ;;  %v3887_v35 = vld [vmem:[#allocation4 + $0x60] sm:$0xff]   ;;  %v3896_v38 = vld [vmem:[#allocation4 + $0x18] sm:$0xff]   ;;  %v3902_v40 = vld [vmem:[#allocation4 + $0x10] sm:$0xff]  }
  0x6c   :  { %v579_v21 = vrot.slane %v551_v1, %v3514_v18  ;;  %1342 = vmatpush2.bf16.msra.mxu1 %v3216_v2  ;;  %v681_v57 = vcombine.high %v658_v43, %v665_v48  ;;  %v731_v0 = vrot.slane %v715_v56, %v3514_v18  ;;  %v680_v6 = vcombine.low %v658_v43, %v665_v48  ;;  %v3890_v36 = vld [vmem:[#allocation4 + $0x20] sm:$0xff]  }
  0x6d   :  { %1343 = vmatprep.subr.bf16.mxu1 %v3217_v8  ;;  %v616_v52 = vcombine.low %v606_v10, %v613_v11  ;;  %v3913_v43 = vsub.s32 1, %v3505_v14 }
  0x6e   :  { %v581_v30 = vcombine.low %v565_v20, %v579_v21  ;;  %v697_v1 = vrot.slane %v681_v57, %v3514_v18 }
  0x6f   :  { %v638_v62 = vrot.slane %v616_v52, %v3514_v18 }
  0x70   :  { %1344 = vmatpush2.bf16.msra.mxu1 %v3219_v22 }
  0x71   :  { %999 = vmatmul.mubr.bf16.gmra.mxu0 %v382_v28  ;;  %v617_v28 = vcombine.high %v606_v10, %v613_v11  ;;  %1345 = vmatprep.subr.bf16.mxu1 %v3220_v25  ;;  %v646_v5 = vcombine.low %v624_v61, %v638_v62  ;;  %v690_v11 = vrot.slane %v680_v6, %v3514_v18  ;;  %v3225_v25 = vld [vmem:[#allocation2 + $0xa0] ss:$8 sps:$4 sm:$0xff]  }
  0x72   :  { %1008 = vmatprep.mubr.bf16.mxu0 %v449_v32  ;;  %v650_v32 = vcombine.low %v132_v15, %v133_v16 }
  0x73   :  { %v645_v42 = vrot.slane %v617_v28, %v3514_v18  ;;  %v3229_v28 = vld [vmem:[#allocation2 + $0x84] ss:$8 sps:$4 sm:$0xff]  }
  0x74   :  { %v672_v49 = vrot.slane %v650_v32, %v3514_v18  ;;  %1346 = vmatpush2.bf16.msra.mxu1 %v3222_v34  ;;  %v3234_v32 = vld [vmem:[#allocation4 + $0x70] sm:$0xff]   ;;  %v3885_v34 = vld [vmem:[#allocation4 + $0x28] sm:$0xff]  }
  0x75   :  { %v647_v54 = vcombine.low %v631_v41, %v645_v42  ;;  %1347 = vmatprep.subr.bf16.mxu1 %v3223_v24  ;;  %v3905_v41 = vld [vmem:[#allocation4 + $0x48] sm:$0xff]  }
  0x76   :  { %v683_v58 = vcombine.high %v672_v49, %v679_v50  ;;  %v682_v7 = vcombine.low %v672_v49, %v679_v50  ;;  %v3908_v42 = vld [vmem:[#allocation4 + $0x8] sm:$0xff]  }
  0x78   :  { %v711_v2 = vrot.slane %v683_v58, %v3514_v18  ;;  %v704_v12 = vrot.slane %v682_v7, %v3514_v18  ;;  %1348 = vmatpush2.bf16.msra.mxu1 %v3225_v25 }
  0x79   :  { %1009 = vmatmul.mubr.bf16.gmra.mxu0 %v448_v59  ;;  %v716_v59 = vcombine.low %v140_v44, %v141_v45  ;;  %v3916_v44 = vsub.s32 0, %v3505_v14  ;;  %v176_v45 = vld [vmem:[%s4250_s2] sm:$0x3] }
  0x7a   :  { %1018 = vmatprep.mubr.bf16.mxu0 %v515_v63  ;;  %v724_v63 = vrot.slane %v714_v55, %v3514_v18  ;;  %v713_v8 = vcombine.low %v697_v1, %v711_v2  ;;  %v712_v16 = vcombine.low %v690_v11, %v704_v12  ;;  %v3922_v47 = vrot.slane %v176_v45, %v3913_v43 }
  0x7b   :  { %v738_v3 = vrot.slane %v716_v59, %v3514_v18  ;;  %v3925_v48 = vrot.slane %v176_v45, %v3916_v44 }
  0x7c   :  { %v747_v9 = vcombine.high %v724_v63, %v731_v0  ;;  %v746_v17 = vcombine.low %v724_v63, %v731_v0 }
  0x7d   :  { %v749_v10 = vcombine.high %v738_v3, %v745_v4  ;;  %v748_v19 = vcombine.low %v738_v3, %v745_v4 }
  0x7e   :  { %v763_v13 = vrot.slane %v747_v9, %v3514_v18  ;;  %v756_v21 = vrot.slane %v746_v17, %v3514_v18 }
  0x7f   :  { %v777_v15 = vrot.slane %v749_v10, %v3514_v18  ;;  %v770_v22 = vrot.slane %v748_v19, %v3514_v18  ;;  %v3235_v18 = vld [vmem:[#allocation4 + $0x30] sm:$0xff]  }
  0x81   :  { %1019 = vmatmul.mubr.bf16.gmra.mxu0 %v514_v26  ;;  %v779_v20 = vcombine.low %v763_v13, %v777_v15  ;;  %v778_v23 = vcombine.low %v756_v21, %v770_v22  ;;  %v3226_v26 = vld [vmem:[#allocation2 + $0x94] ss:$8 sps:$4 sm:$0xff]  }
  0x82   :  { %1028 = vmatprep.mubr.bf16.mxu0 %v581_v30  ;;  %1349 = vmatprep.subr.bf16.mxu1 %v3226_v26  ;;  %v3232_v30 = vld [vmem:[#allocation4 + $0x78] sm:$0xff]  }
  0x83   :  { %1350 = vmatpush2.bf16.msra.mxu1 %v3228_v27  ;;  %2917 = vmatprep.subr.bf16.mxu0 %v3232_v30 }
  0x84   :  { %1351 = vmatprep.subr.bf16.mxu1 %v3229_v28  ;;  %2918 = vmatpush3.bf16.msra.mxu0 %v3233_v31 }
  0x85   :  { %2919 = vmatprep.subr.bf16.mxu0 %v3234_v32 }
  0x87   :  { %1352 = vmatpush2.bf16.msra.mxu1 %v3231_v29 }
  0x88   :  { %3109 = vmatprep.subr.bf16.mxu1 %v3232_v30  ;;  %2920 = vmatpush3.bf16.msra.mxu0 %v3235_v18 }
  0x89   :  { %1029 = vmatmul.mubr.bf16.gmra.mxu0 %v580_v53  ;;  %2921 = vmatprep.subr.bf16.mxu0 %v3236_v33 }
  0x8a   :  { %1038 = vmatprep.mubr.bf16.mxu0 %v647_v54 }
  0x8c   :  { %2922 = vmatpush3.bf16.msra.mxu0 %v3885_v34 }
  0x8d   :  { %2923 = vmatprep.subr.bf16.mxu0 %v3887_v35 }
  0x90   :  { %2924 = vmatpush3.bf16.msra.mxu0 %v3890_v36 }
  0x91   :  { %1039 = vmatmul.mubr.bf16.gmra.mxu0 %v646_v5  ;;  %2925 = vmatprep.subr.bf16.mxu0 %v3893_v37 }
  0x92   :  { %1048 = vmatprep.mubr.bf16.mxu0 %v713_v8 }
  0x94   :  { %2926 = vmatpush3.bf16.msra.mxu0 %v3896_v38 }
  0x95   :  { %2927 = vmatprep.subr.bf16.mxu0 %v3899_v39 }
  0x98   :  { %2928 = vmatpush3.bf16.msra.mxu0 %v3902_v40 }
  0x99   :  { %1049 = vmatmul.mubr.bf16.gmra.mxu0 %v712_v16  ;;  %2929 = vmatprep.subr.bf16.mxu0 %v3905_v41 }
  0x9a   :  { %1058 = vmatprep.mubr.bf16.mxu0 %v779_v20 }
  0x9c   :  { %2930 = vmatpush3.bf16.msra.mxu0 %v3908_v42 }
  0xa1   :  { %1059 = vmatmul.mubr.bf16.gmra.mxu0 %v778_v23 }
 0x129   :  { %v990_v46 = vpop.f32.mrf.mxu0 }
 0x12a   :  { %v991_v53 = vadd.f32 %v990_v46, %v3925_v48 }
 0x12b   :  { %v992_v49 = vpop.f32.mrf.mxu0 }
 0x12c   :  { %v993_v51 = vadd.f32 %v992_v49, %v3922_v47  ;;  %v1069_v60 = vmax.f32 %v991_v53, 0.0 }
 0x12d   :  { %v994_v50 = vpop.f32.mrf.mxu0 }
 0x12e   :  { %v995_v52 = vadd.f32 %v994_v50, %v3925_v48  ;;  %v1070_v58 = vmax.f32 %v993_v51, 0.0 }
 0x12f   :  { %v996_v54 = vpop.f32.mrf.mxu0 }
 0x130   :  { %v997_v55 = vadd.f32 %v996_v54, %v3922_v47  ;;  %v1071_v56 = vmax.f32 %v995_v52, 0.0 }
 0x131   :  { %v1000_v57 = vpop.f32.mrf.mxu0 }
 0x132   :  { %v1072_v59 = vmax.f32 %v997_v55, 0.0  ;;  %v1101_v63 = vpack.c.bf16 %v1071_v56, %v1069_v60  ;;  %v1001_v3 = vadd.f32 %v1000_v57, %v3925_v48 }
 0x133   :  { %v1002_v61 = vpop.f32.mrf.mxu0 }
 0x134   :  { %v1102_v62 = vpack.c.bf16 %v1072_v59, %v1070_v58  ;;  %v1003_v1 = vadd.f32 %v1002_v61, %v3922_v47  ;;  %v1073_v10 = vmax.f32 %v1001_v3, 0.0 }
 0x135   :  { %v1004_v0 = vpop.f32.mrf.mxu0 }
 0x136   :  { %v1005_v2 = vadd.f32 %v1004_v0, %v3925_v48  ;;  %1353 = vmatprep.mubr.bf16.mxu1 %v1102_v62  ;;  %v1074_v8 = vmax.f32 %v1003_v1, 0.0 }
 0x137   :  { %v1006_v4 = vpop.f32.mrf.mxu0  ;;  %1354 = vmatmul.mubr.bf16.vlgmr.msra.gmra.mxu1 %v1101_v63 }
 0x138   :  { %v1007_v5 = vadd.f32 %v1006_v4, %v3922_v47  ;;  %3117 = vmatpush3.bf16.msra.mxu1 %v3233_v31  ;;  %v1075_v6 = vmax.f32 %v1005_v2, 0.0 }
 0x139   :  { %v1010_v7 = vpop.f32.mrf.mxu0  ;;  %3110 = vmatprep.subr.bf16.mxu1 %v3234_v32 }
 0x13a   :  { %v1076_v9 = vmax.f32 %v1007_v5, 0.0  ;;  %v1103_v13 = vpack.c.bf16 %v1075_v6, %v1073_v10  ;;  %v1011_v19 = vadd.f32 %v1010_v7, %v3925_v48 }
 0x13b   :  { %v1012_v11 = vpop.f32.mrf.mxu0 }
 0x13c   :  { %v1104_v12 = vpack.c.bf16 %v1076_v9, %v1074_v8  ;;  %3118 = vmatpush3.bf16.msra.mxu1 %v3235_v18  ;;  %v1013_v16 = vadd.f32 %v1012_v11, %v3922_v47  ;;  %v1077_v26 = vmax.f32 %v1011_v19, 0.0 }
 0x13d   :  { %v1014_v15 = vpop.f32.mrf.mxu0  ;;  %3111 = vmatprep.subr.bf16.mxu1 %v3236_v33 }
 0x13e   :  { %v1015_v17 = vadd.f32 %v1014_v15, %v3925_v48  ;;  %1363 = vmatprep.mubr.bf16.mxu1 %v1104_v12  ;;  %v1078_v24 = vmax.f32 %v1013_v16, 0.0 }
 0x13f   :  { %v1016_v20 = vpop.f32.mrf.mxu0  ;;  %1364 = vmatmul.mubr.bf16.gmra.mxu1 %v1103_v13 }
 0x140   :  { %v1017_v21 = vadd.f32 %v1016_v20, %v3922_v47  ;;  %3119 = vmatpush3.bf16.msra.mxu1 %v3885_v34  ;;  %v1079_v22 = vmax.f32 %v1015_v17, 0.0 }
 0x141   :  { %v1020_v23 = vpop.f32.mrf.mxu0  ;;  %3112 = vmatprep.subr.bf16.mxu1 %v3887_v35 }
 0x142   :  { %v1080_v25 = vmax.f32 %v1017_v21, 0.0  ;;  %v1105_v29 = vpack.c.bf16 %v1079_v22, %v1077_v26  ;;  %v1021_v18 = vadd.f32 %v1020_v23, %v3925_v48 }
 0x143   :  { %v1022_v27 = vpop.f32.mrf.mxu0 }
 0x144   :  { %v1106_v28 = vpack.c.bf16 %v1080_v25, %v1078_v24  ;;  %3120 = vmatpush3.bf16.msra.mxu1 %v3890_v36  ;;  %v1023_v31 = vadd.f32 %v1022_v27, %v3922_v47 }
 0x145   :  { %v1024_v30 = vpop.f32.mrf.mxu0  ;;  %3113 = vmatprep.subr.bf16.mxu1 %v3893_v37  ;;  %v1081_v37 = vmax.f32 %v1021_v18, 0.0 }
 0x146   :  { %v1025_v32 = vadd.f32 %v1024_v30, %v3925_v48  ;;  %1373 = vmatprep.mubr.bf16.mxu1 %v1106_v28  ;;  %v1082_v36 = vmax.f32 %v1023_v31, 0.0 }
 0x147   :  { %v1026_v33 = vpop.f32.mrf.mxu0  ;;  %1374 = vmatmul.mubr.bf16.gmra.mxu1 %v1105_v29 }
 0x148   :  { %v1027_v34 = vadd.f32 %v1026_v33, %v3922_v47  ;;  %3121 = vmatpush3.bf16.msra.mxu1 %v3896_v38  ;;  %v1083_v35 = vmax.f32 %v1025_v32, 0.0 }
 0x149   :  { %v1030_v45 = vpop.f32.mrf.mxu0  ;;  %3114 = vmatprep.subr.bf16.mxu1 %v3899_v39 }
 0x14a   :  { %v1084_v46 = vmax.f32 %v1027_v34, 0.0  ;;  %v1107_v51 = vpack.c.bf16 %v1083_v35, %v1081_v37  ;;  %v1031_v38 = vadd.f32 %v1030_v45, %v3925_v48  ;;  %v3247_v37 = vld [vmem:[#allocation4] sm:$0xff]  }
 0x14b   :  { %v1032_v49 = vpop.f32.mrf.mxu0 }
 0x14c   :  { %v1108_v50 = vpack.c.bf16 %v1084_v46, %v1082_v36  ;;  %3122 = vmatpush3.bf16.msra.mxu1 %v3902_v40  ;;  %v1033_v53 = vadd.f32 %v1032_v49, %v3922_v47  ;;  %v1085_v59 = vmax.f32 %v1031_v38, 0.0  ;;  %v3246_v46 = vld [vmem:[#allocation4 + $0x40] sm:$0xff]  }
 0x14d   :  { %v1034_v52 = vpop.f32.mrf.mxu0  ;;  %3115 = vmatprep.subr.bf16.mxu1 %v3905_v41  ;;  %2931 = vmatprep.subr.bf16.mxu0 %v3246_v46  ;;  %v3250_v49 = vld [vmem:[#allocation6 + $0xe4] ss:$16 sps:$4 sm:$0xff]  }
 0x14e   :  { %v1035_v54 = vadd.f32 %v1034_v52, %v3925_v48  ;;  %1383 = vmatprep.mubr.bf16.mxu1 %v1108_v50  ;;  %v1086_v40 = vmax.f32 %v1033_v53, 0.0  ;;  %2932 = vmatpush3.bf16.msra.mxu0 %v3247_v37 }
 0x14f   :  { %v1036_v55 = vpop.f32.mrf.mxu0  ;;  %1384 = vmatmul.mubr.bf16.gmra.mxu1 %v1107_v51 }
 0x150   :  { %v1037_v39 = vadd.f32 %v1036_v55, %v3922_v47  ;;  %3123 = vmatpush3.bf16.msra.mxu1 %v3908_v42  ;;  %v1087_v56 = vmax.f32 %v1035_v54, 0.0 }
 0x151   :  { %v1040_v57 = vpop.f32.mrf.mxu0  ;;  %3116 = vmatprep.subr.bf16.mxu1 %v3246_v46 }
 0x152   :  { %v1088_v58 = vmax.f32 %v1037_v39, 0.0  ;;  %v1109_v61 = vpack.c.bf16 %v1087_v56, %v1085_v59  ;;  %v1041_v1 = vadd.f32 %v1040_v57, %v3925_v48 }
 0x153   :  { %v1042_v60 = vpop.f32.mrf.mxu0 }
 0x154   :  { %v1110_v41 = vpack.c.bf16 %v1088_v58, %v1086_v40  ;;  %v1043_v63 = vadd.f32 %v1042_v60, %v3922_v47  ;;  %v1089_v7 = vmax.f32 %v1041_v1, 0.0  ;;  %3124 = vmatpush3.bf16.msra.mxu1 %v3247_v37 }
 0x155   :  { %v1044_v62 = vpop.f32.mrf.mxu0  ;;  %1952 = vmatprep.subr.bf16.mxu1 %v3250_v49 }
 0x156   :  { %v1045_v0 = vadd.f32 %v1044_v62, %v3925_v48  ;;  %1393 = vmatprep.mubr.bf16.mxu1 %v1110_v41  ;;  %v1090_v5 = vmax.f32 %v1043_v63, 0.0  ;;  %v3251_v63 = vld [vmem:[#allocation6 + $0xe8] ss:$16 sps:$4 sm:$0xff]  }
 0x157   :  { %v1046_v2 = vpop.f32.mrf.mxu0  ;;  %1394 = vmatmul.mubr.bf16.gmra.mxu1 %v1109_v61 }
 0x158   :  { %v1047_v42 = vadd.f32 %v1046_v2, %v3922_v47  ;;  %v1091_v3 = vmax.f32 %v1045_v0, 0.0  ;;  %v3259_v2 = vld [vmem:[#allocation6 + $0xcc] ss:$16 sps:$4 sm:$0xff]  }
 0x159   :  { %v1050_v4 = vpop.f32.mrf.mxu0 }
 0x15a   :  { %v1092_v6 = vmax.f32 %v1047_v42, 0.0  ;;  %v1111_v10 = vpack.c.bf16 %v1091_v3, %v1089_v7  ;;  %v1051_v15 = vadd.f32 %v1050_v4, %v3925_v48  ;;  %v3257_v7 = vld [vmem:[#allocation6 + $0xc8] ss:$16 sps:$4 sm:$0xff]  }
 0x15b   :  { %v1052_v8 = vpop.f32.mrf.mxu0 }
 0x15c   :  { %v1112_v9 = vpack.c.bf16 %v1092_v6, %v1090_v5  ;;  %v1053_v12 = vadd.f32 %v1052_v8, %v3922_v47  ;;  %v1093_v23 = vmax.f32 %v1051_v15, 0.0 }
 0x15d   :  { %v1054_v11 = vpop.f32.mrf.mxu0 }
 0x15e   :  { %v1055_v13 = vadd.f32 %v1054_v11, %v3925_v48  ;;  %1403 = vmatprep.mubr.bf16.mxu1 %v1112_v9  ;;  %v1094_v21 = vmax.f32 %v1053_v12, 0.0 }
 0x15f   :  { %v1056_v16 = vpop.f32.mrf.mxu0  ;;  %1404 = vmatmul.mubr.bf16.gmra.mxu1 %v1111_v10  ;;  %v3265_v10 = vld [vmem:[#allocation6 + $0xac] ss:$16 sps:$4 sm:$0xff]  }
 0x160   :  { %v1057_v17 = vadd.f32 %v1056_v16, %v3922_v47  ;;  %v1095_v19 = vmax.f32 %v1055_v13, 0.0 }
 0x161   :  { %v1060_v20 = vpop.f32.mrf.mxu0 }
 0x162   :  { %v1096_v22 = vmax.f32 %v1057_v17, 0.0  ;;  %v1113_v26 = vpack.c.bf16 %v1095_v19, %v1093_v23  ;;  %v1061_v30 = vadd.f32 %v1060_v20, %v3925_v48  ;;  %v3263_v17 = vld [vmem:[#allocation6 + $0xa8] ss:$16 sps:$4 sm:$0xff]  }
 0x163   :  { %v1062_v24 = vpop.f32.mrf.mxu0 }
 0x164   :  { %v1114_v25 = vpack.c.bf16 %v1096_v22, %v1094_v21  ;;  %v1063_v28 = vadd.f32 %v1062_v24, %v3922_v47  ;;  %v1097_v35 = vmax.f32 %v1061_v30, 0.0  ;;  %v3271_v21 = vld [vmem:[#allocation6 + $0x8c] ss:$16 sps:$4 sm:$0xff]  }
 0x165   :  { %v1064_v27 = vpop.f32.mrf.mxu0  ;;  %v3277_v30 = vld [vmem:[#allocation6 + $0x6c] ss:$16 sps:$4 sm:$0xff]  }
 0x166   :  { %v1065_v29 = vadd.f32 %v1064_v27, %v3925_v48  ;;  %1413 = vmatprep.mubr.bf16.mxu1 %v1114_v25  ;;  %v1098_v33 = vmax.f32 %v1063_v28, 0.0  ;;  %v3253_v48 = vld [vmem:[#allocation6 + $0xec] ss:$16 sps:$4 sm:$0xff]   ;;  %v3269_v27 = vld [vmem:[#allocation6 + $0x88] ss:$16 sps:$4 sm:$0xff]  }
 0x167   :  { %v1066_v31 = vpop.f32.mrf.mxu0  ;;  %1414 = vmatmul.mubr.bf16.gmra.mxu1 %v1113_v26  ;;  %2065 = vmatprep.subr.bf16.mxu0 %v3253_v48 }
 0x168   :  { %v1067_v32 = vadd.f32 %v1066_v31, %v3922_v47  ;;  %v1099_v18 = vmax.f32 %v1065_v29, 0.0  ;;  %v1149_v47 = vld [vmem:[%s4252_s4] sm:$0x3] }
 0x169   :  { %v3972_v51 = vrot.slane %v1149_v47, %v3913_v43  ;;  %v3975_v52 = vrot.slane %v1149_v47, %v3916_v44 }
 0x16a   :  { %v1100_v34 = vmax.f32 %v1067_v32, 0.0  ;;  %v1115_v36 = vpack.c.bf16 %v1099_v18, %v1097_v35  ;;  %v3275_v35 = vld [vmem:[#allocation6 + $0x68] ss:$16 sps:$4 sm:$0xff]  }
 0x16c   :  { %v1116_v45 = vpack.c.bf16 %v1100_v34, %v1098_v33 }
 0x16e   :  { %1423 = vmatprep.mubr.bf16.mxu1 %v1116_v45 }
 0x16f   :  { %1424 = vmatmul.mubr.bf16.gmra.mxu1 %v1115_v36 }
 0x1f7   :  { %v1355_v50 = vpop.f32.mrf.mxu1 }
 0x1f8   :  { %v1356_v39 = vadd.f32 %v1355_v50, %v3975_v52 }
 0x1f9   :  { %v1357_v53 = vpop.f32.mrf.mxu1 }
 0x1fa   :  { %v1358_v38 = vadd.f32 %v1357_v53, %v3972_v51  ;;  %v1434_v41 = vmax.f32 %v1356_v39, 0.0 }
 0x1fb   :  { %v1359_v54 = vpop.f32.mrf.mxu1 }
 0x1fc   :  { %v1360_v55 = vadd.f32 %v1359_v54, %v3975_v52  ;;  %v1435_v59 = vmax.f32 %v1358_v38, 0.0 }
 0x1fd   :  { %v1361_v56 = vpop.f32.mrf.mxu1 }
 0x1fe   :  { %v1362_v57 = vadd.f32 %v1361_v56, %v3972_v51  ;;  %v1436_v40 = vmax.f32 %v1360_v55, 0.0 }
 0x1ff   :  { %v1365_v58 = vpop.f32.mrf.mxu1 }
 0x200   :  { %v1437_v60 = vmax.f32 %v1362_v57, 0.0  ;;  %v1466_v0 = vpack.c.bf16 %v1436_v40, %v1434_v41  ;;  %v1366_v4 = vadd.f32 %v1365_v58, %v3975_v52 }
 0x201   :  { %v1367_v61 = vpop.f32.mrf.mxu1 }
 0x202   :  { %v1467_v62 = vpack.c.bf16 %v1437_v60, %v1435_v59  ;;  %v1368_v42 = vadd.f32 %v1367_v61, %v3972_v51  ;;  %v1438_v13 = vmax.f32 %v1366_v4, 0.0  ;;  %v3248_v4 = vld [vmem:[#allocation6 + $0xe0] ss:$16 sps:$4 sm:$0xff]  }
 0x203   :  { %v1369_v1 = vpop.f32.mrf.mxu1 }
 0x204   :  { %v1370_v3 = vadd.f32 %v1369_v1, %v3975_v52  ;;  %1649 = vmatprep.mubr.bf16.mxu0 %v1467_v62  ;;  %v1439_v11 = vmax.f32 %v1368_v42, 0.0 }
 0x205   :  { %v1371_v5 = vpop.f32.mrf.mxu1  ;;  %1650 = vmatmul.mubr.bf16.vlgmr.msra.gmra.mxu0 %v1466_v0 }
 0x206   :  { %v1372_v6 = vadd.f32 %v1371_v5, %v3972_v51  ;;  %2066 = vmatpush1.bf16.msra.mxu0 %v3251_v63  ;;  %v1440_v8 = vmax.f32 %v1370_v3, 0.0 }
 0x207   :  { %v1375_v9 = vpop.f32.mrf.mxu1  ;;  %2067 = vmatprep.subr.bf16.mxu0 %v3259_v2 }
 0x208   :  { %v1441_v12 = vmax.f32 %v1372_v6, 0.0  ;;  %v1468_v19 = vpack.c.bf16 %v1440_v8, %v1438_v13  ;;  %v1376_v24 = vadd.f32 %v1375_v9, %v3975_v52  ;;  %v3254_v13 = vld [vmem:[#allocation6 + $0xc0] ss:$16 sps:$4 sm:$0xff]  }
 0x209   :  { %v1377_v15 = vpop.f32.mrf.mxu1 }
 0x20a   :  { %v1469_v16 = vpack.c.bf16 %v1441_v12, %v1439_v11  ;;  %2068 = vmatpush1.bf16.msra.mxu0 %v3257_v7  ;;  %v1378_v22 = vadd.f32 %v1377_v15, %v3972_v51  ;;  %v1442_v18 = vmax.f32 %v1376_v24, 0.0  ;;  %v3256_v7 = vld [vmem:[#allocation6 + $0xc4] ss:$16 sps:$4 sm:$0xff]   ;;  %v3260_v24 = vld [vmem:[#allocation6 + $0xa0] ss:$16 sps:$4 sm:$0xff]  }
 0x20b   :  { %v1379_v20 = vpop.f32.mrf.mxu1  ;;  %2069 = vmatprep.subr.bf16.mxu0 %v3265_v10 }
 0x20c   :  { %v1380_v23 = vadd.f32 %v1379_v20, %v3975_v52  ;;  %1657 = vmatprep.mubr.bf16.mxu0 %v1469_v16  ;;  %v1443_v31 = vmax.f32 %v1378_v22, 0.0 }
 0x20d   :  { %v1381_v25 = vpop.f32.mrf.mxu1  ;;  %1658 = vmatmul.mubr.bf16.gmra.mxu0 %v1468_v19 }
 0x20e   :  { %v1382_v26 = vadd.f32 %v1381_v25, %v3972_v51  ;;  %2070 = vmatpush1.bf16.msra.mxu0 %v3263_v17  ;;  %v1444_v28 = vmax.f32 %v1380_v23, 0.0  ;;  %v3262_v17 = vld [vmem:[#allocation6 + $0xa4] ss:$16 sps:$4 sm:$0xff]  }
 0x20f   :  { %v1385_v29 = vpop.f32.mrf.mxu1  ;;  %2071 = vmatprep.subr.bf16.mxu0 %v3271_v21 }
 0x210   :  { %v1445_v32 = vmax.f32 %v1382_v26, 0.0  ;;  %v1470_v45 = vpack.c.bf16 %v1444_v28, %v1442_v18  ;;  %v1386_v49 = vadd.f32 %v1385_v29, %v3975_v52  ;;  %v3266_v18 = vld [vmem:[#allocation6 + $0x80] ss:$16 sps:$4 sm:$0xff]  }
 0x211   :  { %v1387_v33 = vpop.f32.mrf.mxu1 }
 0x212   :  { %v1471_v34 = vpack.c.bf16 %v1445_v32, %v1443_v31  ;;  %2072 = vmatpush1.bf16.msra.mxu0 %v3269_v27  ;;  %v1388_v46 = vadd.f32 %v1387_v33, %v3972_v51  ;;  %v1446_v55 = vmax.f32 %v1386_v49, 0.0  ;;  %v3268_v27 = vld [vmem:[#allocation6 + $0x84] ss:$16 sps:$4 sm:$0xff]  }
 0x213   :  { %v1389_v36 = vpop.f32.mrf.mxu1  ;;  %2073 = vmatprep.subr.bf16.mxu0 %v3277_v30 }
 0x214   :  { %v1390_v37 = vadd.f32 %v1389_v36, %v3975_v52  ;;  %1665 = vmatprep.mubr.bf16.mxu0 %v1471_v34  ;;  %v1447_v54 = vmax.f32 %v1388_v46, 0.0 }
 0x215   :  { %v1391_v48 = vpop.f32.mrf.mxu1  ;;  %1666 = vmatmul.mubr.bf16.gmra.mxu0 %v1470_v45 }
 0x216   :  { %v1392_v47 = vadd.f32 %v1391_v48, %v3972_v51  ;;  %2074 = vmatpush1.bf16.msra.mxu0 %v3275_v35  ;;  %v1448_v50 = vmax.f32 %v1390_v37, 0.0  ;;  %v3274_v35 = vld [vmem:[#allocation6 + $0x64] ss:$16 sps:$4 sm:$0xff]   ;;  %v3272_v48 = vld [vmem:[#allocation6 + $0x60] ss:$16 sps:$4 sm:$0xff]  }
 0x217   :  { %v1395_v53 = vpop.f32.mrf.mxu1 }
 0x218   :  { %v1449_v38 = vmax.f32 %v1392_v47, 0.0  ;;  %v1472_v57 = vpack.c.bf16 %v1448_v50, %v1446_v55  ;;  %v1396_v60 = vadd.f32 %v1395_v53, %v3975_v52 }
 0x219   :  { %v1397_v39 = vpop.f32.mrf.mxu1 }
 0x21a   :  { %v1473_v56 = vpack.c.bf16 %v1449_v38, %v1447_v54  ;;  %v1398_v58 = vadd.f32 %v1397_v39, %v3972_v51  ;;  %v1450_v2 = vmax.f32 %v1396_v60, 0.0 }
 0x21b   :  { %v1399_v40 = vpop.f32.mrf.mxu1 }
 0x21c   :  { %v1400_v59 = vadd.f32 %v1399_v40, %v3975_v52  ;;  %1673 = vmatprep.mubr.bf16.mxu0 %v1473_v56  ;;  %v1451_v0 = vmax.f32 %v1398_v58, 0.0 }
 0x21d   :  { %v1401_v41 = vpop.f32.mrf.mxu1  ;;  %1674 = vmatmul.mubr.bf16.gmra.mxu0 %v1472_v57 }
 0x21e   :  { %v1402_v61 = vadd.f32 %v1401_v41, %v3972_v51  ;;  %v1452_v62 = vmax.f32 %v1400_v59, 0.0  ;;  %v3280_v41 = vld [vmem:[#allocation6 + $0x44] ss:$16 sps:$4 sm:$0xff]  }
 0x21f   :  { %v1405_v63 = vpop.f32.mrf.mxu1 }
 0x220   :  { %v1453_v1 = vmax.f32 %v1402_v61, 0.0  ;;  %v1474_v5 = vpack.c.bf16 %v1452_v62, %v1450_v2  ;;  %v1406_v10 = vadd.f32 %v1405_v63, %v3975_v52  ;;  %v3283_v61 = vld [vmem:[#allocation6 + $0x4c] ss:$16 sps:$4 sm:$0xff]   ;;  %v3278_v62 = vld [vmem:[#allocation6 + $0x40] ss:$16 sps:$4 sm:$0xff]  }
 0x221   :  { %v1407_v42 = vpop.f32.mrf.mxu1  ;;  %v3281_v63 = vld [vmem:[#allocation6 + $0x48] ss:$16 sps:$4 sm:$0xff]   ;;  %2075 = vmatprep.subr.bf16.mxu0 %v3283_v61  ;;  %v3292_v2 = vld [vmem:[#allocation6 + $0x4] ss:$16 sps:$4 sm:$0xff]  }
 0x222   :  { %v1475_v3 = vpack.c.bf16 %v1453_v1, %v1451_v0  ;;  %v1408_v8 = vadd.f32 %v1407_v42, %v3972_v51  ;;  %v1454_v21 = vmax.f32 %v1406_v10, 0.0  ;;  %2076 = vmatpush1.bf16.msra.mxu0 %v3281_v63  ;;  %v3289_v0 = vld [vmem:[#allocation6 + $0x2c] ss:$16 sps:$4 sm:$0xff]   ;;  %v3287_v1 = vld [vmem:[#allocation6 + $0x28] ss:$16 sps:$4 sm:$0xff]  }
 0x223   :  { %v1409_v6 = vpop.f32.mrf.mxu1  ;;  %2077 = vmatprep.subr.bf16.mxu0 %v3289_v0  ;;  %v3295_v42 = vld [vmem:[#allocation6 + $0xc] ss:$16 sps:$4 sm:$0xff]  }
 0x224   :  { %v1410_v9 = vadd.f32 %v1409_v6, %v3975_v52  ;;  %1681 = vmatprep.mubr.bf16.mxu1 %v1475_v3  ;;  %v1455_v19 = vmax.f32 %v1408_v8, 0.0  ;;  %v3290_v3 = vld [vmem:[#allocation6] ss:$16 sps:$4 sm:$0xff]   ;;  %v3296_v6 = vld [vmem:[%s4257_s9 + $0x78] sm:$0xff]  }
 0x225   :  { %v1411_v11 = vpop.f32.mrf.mxu1  ;;  %1682 = vmatmul.mubr.bf16.vlgmr.msra.gmra.mxu1 %v1474_v5  ;;  %v3402_v5 = vmov 0   ;;  %v3312_v61 = vld [vmem:[%s4257_s9 + $0x58] sm:$0xff]  }
 0x226   :  { %v1412_v12 = vadd.f32 %v1411_v11, %v3972_v51  ;;  %1953 = vmatpush1.bf16.msra.mxu1 %v3248_v4  ;;  %v1456_v15 = vmax.f32 %v1410_v9, 0.0  ;;  %2078 = vmatpush1.bf16.msra.mxu0 %v3287_v1  ;;  %v3293_v4 = vld [vmem:[#allocation6 + $0x8] ss:$16 sps:$4 sm:$0xff]   ;;  %v4020_v11 = vld [vmem:[%s4254_s6] ss:$0 sm:$0xff] }
 0x227   :  { %v1415_v16 = vpop.f32.mrf.mxu1  ;;  %1954 = vmatprep.subr.bf16.mxu1 %v3256_v7  ;;  %2079 = vmatprep.subr.bf16.mxu0 %v3295_v42  ;;  %v3298_v7 = vld [vmem:[%s4257_s9 + $0xf8] sm:$0xff]  }
 0x228   :  { %v1457_v20 = vmax.f32 %v1412_v12, 0.0  ;;  %v1476_v25 = vpack.c.bf16 %v1456_v15, %v1454_v21  ;;  %v1416_v30 = vadd.f32 %v1415_v16, %v3975_v52  ;;  %2097 = vmatprep.mubr.bf16.mxu0 %v3402_v5  ;;  %v3315_v42 = vld [vmem:[%s4257_s9 + $0x98] sm:$0xff]  }
 0x229   :  { %v1417_v22 = vpop.f32.mrf.mxu1 }
 0x22a   :  { %v1477_v23 = vpack.c.bf16 %v1457_v20, %v1455_v19  ;;  %1955 = vmatpush1.bf16.msra.mxu1 %v3254_v13  ;;  %v1418_v28 = vadd.f32 %v1417_v22, %v3972_v51  ;;  %v1458_v46 = vmax.f32 %v1416_v30, 0.0  ;;  %2080 = vmatpush1.bf16.msra.mxu0 %v3293_v4  ;;  %v3302_v30 = vld [vmem:[%s4257_s9 + $0xf0] sm:$0xff]  }
 0x22b   :  { %v1419_v26 = vpop.f32.mrf.mxu1  ;;  %1956 = vmatprep.subr.bf16.mxu1 %v3262_v17  ;;  %3045 = vmatprep.subr.bf16.mxu0 %v3298_v7  ;;  %v3316_v4 = vld [vmem:[%s4257_s9 + $0x50] sm:$0xff]  }
 0x22c   :  { %v1420_v29 = vadd.f32 %v1419_v26, %v3975_v52  ;;  %1689 = vmatprep.mubr.bf16.mxu1 %v1477_v23  ;;  %v1459_v45 = vmax.f32 %v1418_v28, 0.0  ;;  %v3297_v26 = vld [vmem:[%s4257_s9 + $0x38] sm:$0xff]  }
 0x22d   :  { %v1421_v31 = vpop.f32.mrf.mxu1  ;;  %1690 = vmatmul.mubr.bf16.gmra.mxu1 %v1476_v25 }
 0x22e   :  { %v1422_v32 = vadd.f32 %v1421_v31, %v3972_v51  ;;  %1957 = vmatpush1.bf16.msra.mxu1 %v3260_v24  ;;  %v1460_v33 = vmax.f32 %v1420_v29, 0.0  ;;  %v3300_v29 = vld [vmem:[%s4257_s9 + $0x70] sm:$0xff]  }
 0x22f   :  { %v1425_v34 = vpop.f32.mrf.mxu1  ;;  %1958 = vmatprep.subr.bf16.mxu1 %v3268_v27  ;;  %v3299_v27 = vld [vmem:[%s4257_s9 + $0xb8] sm:$0xff]  }
 0x230   :  { %v1461_v36 = vmax.f32 %v1422_v32, 0.0  ;;  %v1478_v47 = vpack.c.bf16 %v1460_v33, %v1458_v46  ;;  %v1426_v38 = vadd.f32 %v1425_v34, %v3975_v52  ;;  %v3301_v34 = vld [vmem:[%s4257_s9 + $0x30] sm:$0xff]   ;;  %v3306_v46 = vld [vmem:[%s4257_s9 + $0xe8] sm:$0xff]  }
 0x231   :  { %v1427_v37 = vpop.f32.mrf.mxu1 }
 0x232   :  { %v1479_v49 = vpack.c.bf16 %v1461_v36, %v1459_v45  ;;  %1959 = vmatpush1.bf16.msra.mxu1 %v3266_v18  ;;  %v1428_v53 = vadd.f32 %v1427_v37, %v3972_v51  ;;  %v1462_v58 = vmax.f32 %v1426_v38, 0.0  ;;  %v3304_v36 = vld [vmem:[%s4257_s9 + $0x68] sm:$0xff]  }
 0x233   :  { %v1429_v50 = vpop.f32.mrf.mxu1  ;;  %1960 = vmatprep.subr.bf16.mxu1 %v3274_v35  ;;  %v3303_v35 = vld [vmem:[%s4257_s9 + $0xb0] sm:$0xff]  }
 0x234   :  { %v1430_v54 = vadd.f32 %v1429_v50, %v3975_v52  ;;  %1697 = vmatprep.mubr.bf16.mxu1 %v1479_v49  ;;  %v1463_v57 = vmax.f32 %v1428_v53, 0.0  ;;  %v3286_v52 = vld [vmem:[#allocation6 + $0x24] ss:$16 sps:$4 sm:$0xff]   ;;  %v3305_v53 = vld [vmem:[%s4257_s9 + $0x28] sm:$0xff]  }
 0x235   :  { %v1431_v55 = vpop.f32.mrf.mxu1  ;;  %1698 = vmatmul.mubr.bf16.gmra.mxu1 %v1478_v47 }
 0x236   :  { %v1432_v39 = vadd.f32 %v1431_v55, %v3972_v51  ;;  %1961 = vmatpush1.bf16.msra.mxu1 %v3272_v48  ;;  %v1464_v56 = vmax.f32 %v1430_v54, 0.0  ;;  %v3284_v51 = vld [vmem:[#allocation6 + $0x20] ss:$16 sps:$4 sm:$0xff]   ;;  %v3307_v54 = vld [vmem:[%s4257_s9 + $0xa8] sm:$0xff]  }
 0x237   :  { %1962 = vmatprep.subr.bf16.mxu1 %v3280_v41  ;;  %v3308_v55 = vld [vmem:[%s4257_s9 + $0x60] sm:$0xff]  }
 0x238   :  { %v1465_v40 = vmax.f32 %v1432_v39, 0.0  ;;  %v1480_v60 = vpack.c.bf16 %v1464_v56, %v1462_v58  ;;  %v3310_v39 = vld [vmem:[%s4257_s9 + $0xe0] sm:$0xff]  }
 0x23a   :  { %v1481_v59 = vpack.c.bf16 %v1465_v40, %v1463_v57  ;;  %1963 = vmatpush1.bf16.msra.mxu1 %v3278_v62  ;;  %v3314_v62 = vld [vmem:[%s4257_s9 + $0xd8] sm:$0xff]  }
 0x23b   :  { %1964 = vmatprep.subr.bf16.mxu1 %v3286_v52 }
 0x23c   :  { %1705 = vmatprep.mubr.bf16.mxu1 %v1481_v59  ;;  %v3309_v59 = vld [vmem:[%s4257_s9 + $0x20] sm:$0xff]  }
 0x23d   :  { %1706 = vmatmul.mubr.bf16.gmra.mxu1 %v1480_v60  ;;  %v3311_v60 = vld [vmem:[%s4257_s9 + $0xa0] sm:$0xff]  }
 0x23e   :  { %1965 = vmatpush1.bf16.msra.mxu1 %v3284_v51  ;;  %1984 = vmatprep.mubr.bf16.mxu1 %v3402_v5 }
 0x23f   :  { %1966 = vmatprep.subr.bf16.mxu1 %v3292_v2  ;;  %v3313_v2 = vld [vmem:[%s4257_s9 + $0x18] sm:$0xff]  }
 0x242   :  { %1967 = vmatpush1.bf16.msra.mxu1 %v3290_v3 }
 0x243   :  { %2981 = vmatprep.subr.bf16.mxu1 %v3296_v6  ;;  %v3318_v6 = vld [vmem:[%s4257_s9 + $0xd0] sm:$0xff]  }
 0x2c5   :  { %v2933_v8 = vpop.f32.mrf.mxu0 }
 0x2c7   :  { %v2934_v9 = vpop.f32.mrf.mxu0 }
 0x2c8   :  { %v2935_v10 = vadd.f32 %v2934_v9, %v2933_v8 }
 0x2c9   :  { %v2936_v12 = vpop.f32.mrf.mxu0 }
 0x2ca   :  { %v1652_v15 = vadd.f32 %v2935_v10, %v4020_v11 }
 0x2cb   :  { %v2937_v13 = vpop.f32.mrf.mxu0 }
 0x2cc   :  { %v2938_v16 = vadd.f32 %v2937_v13, %v2936_v12  ;;  %v1714_v21 = vmax.f32 %v1652_v15, 0.0  ;;  %v3317_v12 = vld [vmem:[%s4257_s9 + $0x10] sm:$0xff]  }
 0x2cd   :  { %v2939_v17 = vpop.f32.mrf.mxu0  ;;  %v3319_v13 = vld [vmem:[%s4257_s9 + $0x90] sm:$0xff]  }
 0x2ce   :  { %v1655_v19 = vadd.f32 %v2938_v16, %v4020_v11  ;;  %v3320_v16 = vld [vmem:[%s4257_s9 + $0x48] sm:$0xff]  }
 0x2cf   :  { %v2940_v20 = vpop.f32.mrf.mxu0 }
 0x2d0   :  { %v1715_v22 = vmax.f32 %v1655_v19, 0.0  ;;  %v2941_v23 = vadd.f32 %v2940_v20, %v2939_v17  ;;  %v3322_v17 = vld [vmem:[%s4257_s9 + $0xc8] sm:$0xff]  }
 0x2d1   :  { %v2942_v24 = vpop.f32.mrf.mxu0 }
 0x2d2   :  { %v1730_v25 = vpack.c.bf16 %v1715_v22, %v1714_v21  ;;  %v1660_v31 = vadd.f32 %v2941_v23, %v4020_v11 }
 0x2d3   :  { %v2943_v28 = vpop.f32.mrf.mxu0 }
 0x2d4   :  { %v2944_v32 = vadd.f32 %v2943_v28, %v2942_v24  ;;  %1985 = vmatmul.mubr.bf16.vlgmr.msra.gmra.mxu1 %v1730_v25  ;;  %2098 = vmatmul.mubr.bf16.vlgmr.msra.gmra.mxu0 %v1730_v25  ;;  %v1716_v37 = vmax.f32 %v1660_v31, 0.0  ;;  %v3321_v24 = vld [vmem:[%s4257_s9 + $0x8] sm:$0xff]  }
 0x2d5   :  { %v2945_v18 = vpop.f32.mrf.mxu0  ;;  %1994 = vmatprep.mubr.bf16.mxu1 %v3402_v5  ;;  %2107 = vmatprep.mubr.bf16.mxu0 %v3402_v5 }
 0x2d6   :  { %v1663_v33 = vadd.f32 %v2944_v32, %v4020_v11  ;;  %2982 = vmatpush3.bf16.msra.mxu1 %v3297_v26  ;;  %3046 = vmatpush3.bf16.msra.mxu0 %v3299_v27 }
 0x2d7   :  { %v2946_v45 = vpop.f32.mrf.mxu0  ;;  %2983 = vmatprep.subr.bf16.mxu1 %v3300_v29  ;;  %3047 = vmatprep.subr.bf16.mxu0 %v3302_v30 }
 0x2d8   :  { %v1717_v49 = vmax.f32 %v1663_v33, 0.0  ;;  %v2947_v48 = vadd.f32 %v2946_v45, %v2945_v18 }
 0x2d9   :  { %v2948_v47 = vpop.f32.mrf.mxu0 }
 0x2da   :  { %v1731_v50 = vpack.c.bf16 %v1717_v49, %v1716_v37  ;;  %2984 = vmatpush3.bf16.msra.mxu1 %v3301_v34  ;;  %3048 = vmatpush3.bf16.msra.mxu0 %v3303_v35  ;;  %v1668_v56 = vadd.f32 %v2947_v48, %v4020_v11 }
 0x2db   :  { %v2949_v38 = vpop.f32.mrf.mxu0  ;;  %2985 = vmatprep.subr.bf16.mxu1 %v3304_v36  ;;  %3049 = vmatprep.subr.bf16.mxu0 %v3306_v46 }
 0x2dc   :  { %v2950_v57 = vadd.f32 %v2949_v38, %v2948_v47  ;;  %1995 = vmatmul.mubr.bf16.gmra.mxu1 %v1731_v50  ;;  %2108 = vmatmul.mubr.bf16.gmra.mxu0 %v1731_v50  ;;  %v1718_v63 = vmax.f32 %v1668_v56, 0.0 }
 0x2dd   :  { %v2951_v40 = vpop.f32.mrf.mxu0  ;;  %2004 = vmatprep.mubr.bf16.mxu1 %v3402_v5  ;;  %2117 = vmatprep.mubr.bf16.mxu0 %v3402_v5 }
 0x2de   :  { %v1671_v58 = vadd.f32 %v2950_v57, %v4020_v11  ;;  %2986 = vmatpush3.bf16.msra.mxu1 %v3305_v53  ;;  %3050 = vmatpush3.bf16.msra.mxu0 %v3307_v54 }
 0x2df   :  { %v2952_v41 = vpop.f32.mrf.mxu0  ;;  %2987 = vmatprep.subr.bf16.mxu1 %v3308_v55  ;;  %3051 = vmatprep.subr.bf16.mxu0 %v3310_v39 }
 0x2e0   :  { %v1719_v52 = vmax.f32 %v1671_v58, 0.0  ;;  %v2953_v0 = vadd.f32 %v2952_v41, %v2951_v40 }
 0x2e1   :  { %v2954_v51 = vpop.f32.mrf.mxu0 }
 0x2e2   :  { %v1732_v1 = vpack.c.bf16 %v1719_v52, %v1718_v63  ;;  %2988 = vmatpush3.bf16.msra.mxu1 %v3309_v59  ;;  %3052 = vmatpush3.bf16.msra.mxu0 %v3311_v60  ;;  %v1676_v7 = vadd.f32 %v2953_v0, %v4020_v11 }
 0x2e3   :  { %v2955_v3 = vpop.f32.mrf.mxu0  ;;  %2989 = vmatprep.subr.bf16.mxu1 %v3312_v61  ;;  %3053 = vmatprep.subr.bf16.mxu0 %v3314_v62 }
 0x2e4   :  { %v2956_v8 = vadd.f32 %v2955_v3, %v2954_v51  ;;  %2005 = vmatmul.mubr.bf16.gmra.mxu1 %v1732_v1  ;;  %2118 = vmatmul.mubr.bf16.gmra.mxu0 %v1732_v1  ;;  %v1720_v19 = vmax.f32 %v1676_v7, 0.0  ;;  %v3324_v3 = vld [vmem:[%s4257_s9 + $0x40] sm:$0xff]   ;;  %v1782_v7 = vsub.s32 2, %v3505_v14 }
 0x2e5   :  { %v2957_v9 = vpop.f32.mrf.mxu1  ;;  %2014 = vmatprep.mubr.bf16.mxu1 %v3402_v5  ;;  %2127 = vmatprep.mubr.bf16.mxu0 %v3402_v5 }
 0x2e6   :  { %v1679_v10 = vadd.f32 %v2956_v8, %v4020_v11  ;;  %2990 = vmatpush3.bf16.msra.mxu1 %v3313_v2  ;;  %3054 = vmatpush3.bf16.msra.mxu0 %v3315_v42  ;;  %v3323_v42 = vld [vmem:[%s4257_s9 + $0x88] sm:$0xff]   ;;  %v1770_v8 = vld [vmem:[%s4256_s8] sm:$0xf] }
 0x2e7   :  { %v2958_v15 = vpop.f32.mrf.mxu1  ;;  %2991 = vmatprep.subr.bf16.mxu1 %v3316_v4  ;;  %3055 = vmatprep.subr.bf16.mxu0 %v3318_v6  ;;  %v3327_v4 = vld [vmem:[%s4257_s9 + $0x80] sm:$0xff]   ;;  %v1786_v6 = vsub.s32 3, %v3505_v14 }
 0x2e8   :  { %v1721_v20 = vmax.f32 %v1679_v10, 0.0  ;;  %v2959_v21 = vadd.f32 %v2958_v15, %v2957_v9  ;;  %v4153_v15 = vrot.slane %v1770_v8, %v3916_v44 }
 0x2e9   :  { %v2960_v22 = vpop.f32.mrf.mxu1 }
 0x2ea   :  { %v1733_v23 = vpack.c.bf16 %v1721_v20, %v1720_v19  ;;  %2992 = vmatpush3.bf16.msra.mxu1 %v3317_v12  ;;  %3056 = vmatpush3.bf16.msra.mxu0 %v3319_v13  ;;  %v1684_v26 = vadd.f32 %v2959_v21, %v4020_v11  ;;  %v4148_v12 = vrot.slane %v1770_v8, %v3913_v43 }
 0x2eb   :  { %v2961_v25 = vpop.f32.mrf.mxu1  ;;  %2993 = vmatprep.subr.bf16.mxu1 %v3320_v16  ;;  %3057 = vmatprep.subr.bf16.mxu0 %v3322_v17  ;;  %v4150_v13 = vrot.slane %v1770_v8, %v1786_v6  ;;  %v4155_v16 = vrot.slane %v1770_v8, %v1782_v7 }
 0x2ec   :  { %v2962_v27 = vadd.f32 %v2961_v25, %v2960_v22  ;;  %2015 = vmatmul.mubr.bf16.gmra.mxu1 %v1733_v23  ;;  %2128 = vmatmul.mubr.bf16.gmra.mxu0 %v1733_v23  ;;  %v1722_v31 = vmax.f32 %v1684_v26, 0.0 }
 0x2ed   :  { %v2963_v28 = vpop.f32.mrf.mxu1  ;;  %2024 = vmatprep.mubr.bf16.mxu1 %v3402_v5  ;;  %2137 = vmatprep.mubr.bf16.mxu0 %v3402_v5 }
 0x2ee   :  { %v1687_v29 = vadd.f32 %v2962_v27, %v4020_v11  ;;  %2994 = vmatpush3.bf16.msra.mxu1 %v3321_v24  ;;  %3058 = vmatpush3.bf16.msra.mxu0 %v3323_v42 }
 0x2ef   :  { %v2964_v30 = vpop.f32.mrf.mxu1  ;;  %2995 = vmatprep.subr.bf16.mxu1 %v3324_v3 }
 0x2f0   :  { %v1723_v32 = vmax.f32 %v1687_v29, 0.0  ;;  %v2965_v18 = vadd.f32 %v2964_v30, %v2963_v28 }
 0x2f1   :  { %v2966_v33 = vpop.f32.mrf.mxu1 }
 0x2f2   :  { %v1734_v34 = vpack.c.bf16 %v1723_v32, %v1722_v31  ;;  %v1692_v45 = vadd.f32 %v2965_v18, %v4020_v11 }
 0x2f3   :  { %v2967_v35 = vpop.f32.mrf.mxu1 }
 0x2f4   :  { %v2968_v36 = vadd.f32 %v2967_v35, %v2966_v33  ;;  %2025 = vmatmul.mubr.bf16.gmra.mxu1 %v1734_v34  ;;  %2138 = vmatmul.mubr.bf16.gmra.mxu0 %v1734_v34  ;;  %v1724_v48 = vmax.f32 %v1692_v45, 0.0 }
 0x2f5   :  { %v2969_v46 = vpop.f32.mrf.mxu1  ;;  %2034 = vmatprep.mubr.bf16.mxu1 %v3402_v5  ;;  %2147 = vmatprep.mubr.bf16.mxu0 %v3402_v5 }
 0x2f6   :  { %v1695_v37 = vadd.f32 %v2968_v36, %v4020_v11 }
 0x2f7   :  { %v2970_v49 = vpop.f32.mrf.mxu1 }
 0x2f8   :  { %v1725_v47 = vmax.f32 %v1695_v37, 0.0  ;;  %v2971_v50 = vadd.f32 %v2970_v49, %v2969_v46 }
 0x2f9   :  { %v2972_v53 = vpop.f32.mrf.mxu1 }
 0x2fa   :  { %v1735_v54 = vpack.c.bf16 %v1725_v47, %v1724_v48  ;;  %v1700_v55 = vadd.f32 %v2971_v50, %v4020_v11 }
 0x2fb   :  { %v2973_v38 = vpop.f32.mrf.mxu1 }
 0x2fc   :  { %v2974_v39 = vadd.f32 %v2973_v38, %v2972_v53  ;;  %2035 = vmatmul.mubr.bf16.gmra.mxu1 %v1735_v54  ;;  %2148 = vmatmul.mubr.bf16.gmra.mxu0 %v1735_v54  ;;  %v1726_v58 = vmax.f32 %v1700_v55, 0.0 }
 0x2fd   :  { %v2975_v56 = vpop.f32.mrf.mxu1  ;;  %2044 = vmatprep.mubr.bf16.mxu1 %v3402_v5  ;;  %2157 = vmatprep.mubr.bf16.mxu0 %v3402_v5 }
 0x2fe   :  { %v1703_v57 = vadd.f32 %v2974_v39, %v4020_v11 }
 0x2ff   :  { %v2976_v40 = vpop.f32.mrf.mxu1 }
 0x300   :  { %v1727_v59 = vmax.f32 %v1703_v57, 0.0  ;;  %v2977_v60 = vadd.f32 %v2976_v40, %v2975_v56 }
 0x301   :  { %v2978_v41 = vpop.f32.mrf.mxu1 }
 0x302   :  { %v1736_v61 = vpack.c.bf16 %v1727_v59, %v1726_v58  ;;  %v1708_v63 = vadd.f32 %v2977_v60, %v4020_v11 }
 0x303   :  { %v2979_v62 = vpop.f32.mrf.mxu1 }
 0x304   :  { %v2980_v52 = vadd.f32 %v2979_v62, %v2978_v41  ;;  %2045 = vmatmul.mubr.bf16.gmra.mxu1 %v1736_v61  ;;  %2158 = vmatmul.mubr.bf16.gmra.mxu0 %v1736_v61  ;;  %v1728_v51 = vmax.f32 %v1708_v63, 0.0 }
 0x305   :  { %2054 = vmatprep.mubr.bf16.mxu1 %v3402_v5  ;;  %2167 = vmatprep.mubr.bf16.mxu0 %v3402_v5  ;;  %v3326_v5 = vld [vmem:[%s4257_s9 + $0xc0] sm:$0xff]  }
 0x306   :  { %v1711_v0 = vadd.f32 %v2980_v52, %v4020_v11  ;;  %v3325_v11 = vld [vmem:[%s4257_s9] sm:$0xff]   ;;  %3059 = vmatprep.subr.bf16.mxu0 %v3326_v5 }
 0x307   :  { %2996 = vmatpush3.bf16.msra.mxu1 %v3325_v11  ;;  %3060 = vmatpush3.bf16.msra.mxu0 %v3327_v4 }
 0x308   :  { %v1729_v1 = vmax.f32 %v1711_v0, 0.0 }
 0x30a   :  { %v1737_v2 = vpack.c.bf16 %v1729_v1, %v1728_v51 }
 0x30c   :  { %2055 = vmatmul.mubr.bf16.gmra.mxu1 %v1737_v2  ;;  %2168 = vmatmul.mubr.bf16.gmra.mxu0 %v1737_v2 }
 0x394   :  { %v1986_v9 = vpop.f32.mrf.mxu1  ;;  %v2099_v10 = vpop.f32.mrf.mxu0 }
 0x395   :  { %v1987_v24 = vadd.f32 %v1986_v9, %v4153_v15  ;;  %v2100_v25 = vadd.f32 %v2099_v10, %v4155_v16 }
 0x396   :  { %v1988_v17 = vpop.f32.mrf.mxu1  ;;  %v2101_v19 = vpop.f32.mrf.mxu0 }
 0x397   :  { %v1989_v21 = vadd.f32 %v1988_v17, %v4148_v12  ;;  %v2102_v22 = vadd.f32 %v2101_v19, %v4150_v13  ;;  %v2178_v45 = vmax.f32 %v1987_v24, 0.0  ;;  %v2180_v36 = vmax.f32 %v2100_v25, 0.0 }
 0x398   :  { %v1990_v20 = vpop.f32.mrf.mxu1  ;;  %v2103_v14 = vpop.f32.mrf.mxu0 }
 0x399   :  { %v1991_v23 = vadd.f32 %v1990_v20, %v4153_v15  ;;  %v2104_v43 = vadd.f32 %v2103_v14, %v4155_v16  ;;  %v2179_v18 = vmax.f32 %v1989_v21, 0.0  ;;  %v2181_v33 = vmax.f32 %v2102_v22, 0.0 }
 0x39a   :  { %v1992_v44 = vpop.f32.mrf.mxu1  ;;  %v2105_v26 = vpop.f32.mrf.mxu0 }
 0x39b   :  { %v1993_v27 = vadd.f32 %v1992_v44, %v4148_v12  ;;  %v2106_v28 = vadd.f32 %v2105_v26, %v4150_v13  ;;  %v2182_v29 = vmax.f32 %v1991_v23, 0.0  ;;  %v2184_v30 = vmax.f32 %v2104_v43, 0.0 }
 0x39c   :  { %v1996_v31 = vpop.f32.mrf.mxu1  ;;  %v2109_v32 = vpop.f32.mrf.mxu0 }
 0x39d   :  { %v2183_v34 = vmax.f32 %v1993_v27, 0.0  ;;  %v2185_v35 = vmax.f32 %v2106_v28, 0.0  ;;  %v2242_v47 = vpack.c.bf16 %v2182_v29, %v2178_v45  ;;  %v2244_v50 = vpack.c.bf16 %v2184_v30, %v2180_v36 }
 0x39e   :  { %v1998_v46 = vpop.f32.mrf.mxu1  ;;  %v2111_v37 = vpop.f32.mrf.mxu0  ;;  %v1997_v57 = vadd.f32 %v1996_v31, %v4153_v15  ;;  %v2110_v40 = vadd.f32 %v2109_v32, %v4155_v16 }
 0x39f   :  { %v2243_v49 = vpack.c.bf16 %v2183_v34, %v2179_v18  ;;  %v2245_v48 = vpack.c.bf16 %v2185_v35, %v2181_v33  ;;  %v1999_v53 = vadd.f32 %v1998_v46, %v4148_v12  ;;  %v2112_v55 = vadd.f32 %v2111_v37, %v4150_v13 }
 0x3a0   :  { %v2000_v54 = vpop.f32.mrf.mxu1  ;;  %v2113_v38 = vpop.f32.mrf.mxu0  ;;  %v2186_v42 = vmax.f32 %v1997_v57, 0.0  ;;  %v2188_v3 = vmax.f32 %v2110_v40, 0.0 }
 0x3a1   :  { %v2001_v39 = vadd.f32 %v2000_v54, %v4153_v15  ;;  %v2114_v56 = vadd.f32 %v2113_v38, %v4155_v16  ;;  %2569 = vmatprep.mubr.bf16.mxu1 %v2243_v49  ;;  %2666 = vmatprep.mubr.bf16.mxu0 %v2245_v48  ;;  %v2187_v0 = vmax.f32 %v1999_v53, 0.0  ;;  %v2189_v51 = vmax.f32 %v2112_v55, 0.0 }
 0x3a2   :  { %v2002_v58 = vpop.f32.mrf.mxu1  ;;  %v2115_v59 = vpop.f32.mrf.mxu0  ;;  %2570 = vmatmul.mubr.bf16.vlgmr.msra.gmra.mxu1 %v2242_v47  ;;  %2667 = vmatmul.mubr.bf16.vlgmr.msra.gmra.mxu0 %v2244_v50 }
 0x3a3   :  { %v2003_v60 = vadd.f32 %v2002_v58, %v4148_v12  ;;  %v2116_v41 = vadd.f32 %v2115_v59, %v4150_v13  ;;  %v2190_v61 = vmax.f32 %v2001_v39, 0.0  ;;  %v2192_v62 = vmax.f32 %v2114_v56, 0.0 }
 0x3a4   :  { %v2006_v63 = vpop.f32.mrf.mxu1  ;;  %v2119_v52 = vpop.f32.mrf.mxu0 }
 0x3a5   :  { %v2191_v1 = vmax.f32 %v2003_v60, 0.0  ;;  %v2193_v2 = vmax.f32 %v2116_v41, 0.0  ;;  %v2246_v7 = vpack.c.bf16 %v2190_v61, %v2186_v42  ;;  %v2248_v8 = vpack.c.bf16 %v2192_v62, %v2188_v3 }
 0x3a6   :  { %v2008_v5 = vpop.f32.mrf.mxu1  ;;  %v2121_v11 = vpop.f32.mrf.mxu0  ;;  %v2007_v21 = vadd.f32 %v2006_v63, %v4153_v15  ;;  %v2120_v22 = vadd.f32 %v2119_v52, %v4155_v16 }
 0x3a7   :  { %v2247_v4 = vpack.c.bf16 %v2191_v1, %v2187_v0  ;;  %v2249_v6 = vpack.c.bf16 %v2193_v2, %v2189_v51  ;;  %v2009_v9 = vadd.f32 %v2008_v5, %v4148_v12  ;;  %v2122_v19 = vadd.f32 %v2121_v11, %v4150_v13 }
 0x3a8   :  { %v2010_v10 = vpop.f32.mrf.mxu1  ;;  %v2123_v17 = vpop.f32.mrf.mxu0  ;;  %v2194_v18 = vmax.f32 %v2007_v21, 0.0  ;;  %v2196_v33 = vmax.f32 %v2120_v22, 0.0 }
 0x3a9   :  { %v2011_v20 = vadd.f32 %v2010_v10, %v4153_v15  ;;  %v2124_v14 = vadd.f32 %v2123_v17, %v4155_v16  ;;  %2577 = vmatprep.mubr.bf16.mxu1 %v2247_v4  ;;  %2674 = vmatprep.mubr.bf16.mxu0 %v2249_v6  ;;  %v2195_v29 = vmax.f32 %v2009_v9, 0.0  ;;  %v2197_v30 = vmax.f32 %v2122_v19, 0.0 }
 0x3aa   :  { %v2012_v23 = vpop.f32.mrf.mxu1  ;;  %v2125_v43 = vpop.f32.mrf.mxu0  ;;  %2578 = vmatmul.mubr.bf16.gmra.mxu1 %v2246_v7  ;;  %2675 = vmatmul.mubr.bf16.gmra.mxu0 %v2248_v8 }
 0x3ab   :  { %v2013_v24 = vadd.f32 %v2012_v23, %v4148_v12  ;;  %v2126_v25 = vadd.f32 %v2125_v43, %v4150_v13  ;;  %v2198_v44 = vmax.f32 %v2011_v20, 0.0  ;;  %v2200_v26 = vmax.f32 %v2124_v14, 0.0 }
 0x3ac   :  { %v2016_v27 = vpop.f32.mrf.mxu1  ;;  %v2129_v28 = vpop.f32.mrf.mxu0 }
 0x3ad   :  { %v2199_v31 = vmax.f32 %v2013_v24, 0.0  ;;  %v2201_v32 = vmax.f32 %v2126_v25, 0.0  ;;  %v2250_v46 = vpack.c.bf16 %v2198_v44, %v2194_v18  ;;  %v2252_v37 = vpack.c.bf16 %v2200_v26, %v2196_v33 }
 0x3ae   :  { %v2018_v34 = vpop.f32.mrf.mxu1  ;;  %v2131_v35 = vpop.f32.mrf.mxu0  ;;  %v2017_v38 = vadd.f32 %v2016_v27, %v4153_v15  ;;  %v2130_v55 = vadd.f32 %v2129_v28, %v4155_v16 }
 0x3af   :  { %v2251_v45 = vpack.c.bf16 %v2199_v31, %v2195_v29  ;;  %v2253_v36 = vpack.c.bf16 %v2201_v32, %v2197_v30  ;;  %v2019_v49 = vadd.f32 %v2018_v34, %v4148_v12  ;;  %v2132_v50 = vadd.f32 %v2131_v35, %v4150_v13 }
 0x3b0   :  { %v2020_v48 = vpop.f32.mrf.mxu1  ;;  %v2133_v47 = vpop.f32.mrf.mxu0  ;;  %v2202_v0 = vmax.f32 %v2017_v38, 0.0  ;;  %v2204_v51 = vmax.f32 %v2130_v55, 0.0 }
 0x3b1   :  { %v2021_v53 = vadd.f32 %v2020_v48, %v4153_v15  ;;  %v2134_v54 = vadd.f32 %v2133_v47, %v4155_v16  ;;  %2585 = vmatprep.mubr.bf16.mxu1 %v2251_v45  ;;  %2682 = vmatprep.mubr.bf16.mxu0 %v2253_v36  ;;  %v2203_v61 = vmax.f32 %v2019_v49, 0.0  ;;  %v2205_v62 = vmax.f32 %v2132_v50, 0.0 }
 0x3b2   :  { %v2022_v39 = vpop.f32.mrf.mxu1  ;;  %v2135_v56 = vpop.f32.mrf.mxu0  ;;  %2586 = vmatmul.mubr.bf16.gmra.mxu1 %v2250_v46  ;;  %2683 = vmatmul.mubr.bf16.gmra.mxu0 %v2252_v37 }
 0x3b3   :  { %v2023_v57 = vadd.f32 %v2022_v39, %v4148_v12  ;;  %v2136_v40 = vadd.f32 %v2135_v56, %v4150_v13  ;;  %v2206_v58 = vmax.f32 %v2021_v53, 0.0  ;;  %v2208_v59 = vmax.f32 %v2134_v54, 0.0 }
 0x3b4   :  { %v2026_v60 = vpop.f32.mrf.mxu1  ;;  %v2139_v41 = vpop.f32.mrf.mxu0 }
 0x3b5   :  { %v2207_v63 = vmax.f32 %v2023_v57, 0.0  ;;  %v2209_v52 = vmax.f32 %v2136_v40, 0.0  ;;  %v2254_v5 = vpack.c.bf16 %v2206_v58, %v2202_v0  ;;  %v2256_v11 = vpack.c.bf16 %v2208_v59, %v2204_v51 }
 0x3b6   :  { %v2028_v1 = vpop.f32.mrf.mxu1  ;;  %v2141_v2 = vpop.f32.mrf.mxu0  ;;  %v2027_v17 = vadd.f32 %v2026_v60, %v4153_v15  ;;  %v2140_v19 = vadd.f32 %v2139_v41, %v4155_v16 }
 0x3b7   :  { %v2255_v42 = vpack.c.bf16 %v2207_v63, %v2203_v61  ;;  %v2257_v3 = vpack.c.bf16 %v2209_v52, %v2205_v62  ;;  %v2029_v4 = vadd.f32 %v2028_v1, %v4148_v12  ;;  %v2142_v8 = vadd.f32 %v2141_v2, %v4150_v13 }
 0x3b8   :  { %v2030_v6 = vpop.f32.mrf.mxu1  ;;  %v2143_v7 = vpop.f32.mrf.mxu0  ;;  %v2210_v29 = vmax.f32 %v2027_v17, 0.0  ;;  %v2212_v30 = vmax.f32 %v2140_v19, 0.0 }
 0x3b9   :  { %v2031_v9 = vadd.f32 %v2030_v6, %v4153_v15  ;;  %v2144_v10 = vadd.f32 %v2143_v7, %v4155_v16  ;;  %2593 = vmatprep.mubr.bf16.mxu1 %v2255_v42  ;;  %2690 = vmatprep.mubr.bf16.mxu0 %v2257_v3  ;;  %v2211_v44 = vmax.f32 %v2029_v4, 0.0  ;;  %v2213_v26 = vmax.f32 %v2142_v8, 0.0 }
 0x3ba   :  { %v2032_v20 = vpop.f32.mrf.mxu1  ;;  %v2145_v14 = vpop.f32.mrf.mxu0  ;;  %2594 = vmatmul.mubr.bf16.gmra.mxu1 %v2254_v5  ;;  %2691 = vmatmul.mubr.bf16.gmra.mxu0 %v2256_v11 }
 0x3bb   :  { %v2033_v21 = vadd.f32 %v2032_v20, %v4148_v12  ;;  %v2146_v22 = vadd.f32 %v2145_v14, %v4150_v13  ;;  %v2214_v23 = vmax.f32 %v2031_v9, 0.0  ;;  %v2216_v43 = vmax.f32 %v2144_v10, 0.0 }
 0x3bc   :  { %v2036_v24 = vpop.f32.mrf.mxu1  ;;  %v2149_v25 = vpop.f32.mrf.mxu0 }
 0x3bd   :  { %v2215_v27 = vmax.f32 %v2033_v21, 0.0  ;;  %v2217_v28 = vmax.f32 %v2146_v22, 0.0  ;;  %v2258_v34 = vpack.c.bf16 %v2214_v23, %v2210_v29  ;;  %v2260_v35 = vpack.c.bf16 %v2216_v43, %v2212_v30 }
 0x3be   :  { %v2038_v31 = vpop.f32.mrf.mxu1  ;;  %v2151_v32 = vpop.f32.mrf.mxu0  ;;  %v2037_v47 = vadd.f32 %v2036_v24, %v4153_v15  ;;  %v2150_v50 = vadd.f32 %v2149_v25, %v4155_v16 }
 0x3bf   :  { %v2259_v18 = vpack.c.bf16 %v2215_v27, %v2211_v44  ;;  %v2261_v33 = vpack.c.bf16 %v2217_v28, %v2213_v26  ;;  %v2039_v45 = vadd.f32 %v2038_v31, %v4148_v12  ;;  %v2152_v37 = vadd.f32 %v2151_v32, %v4150_v13 }
 0x3c0   :  { %v2040_v36 = vpop.f32.mrf.mxu1  ;;  %v2153_v46 = vpop.f32.mrf.mxu0  ;;  %v2218_v61 = vmax.f32 %v2037_v47, 0.0  ;;  %v2220_v62 = vmax.f32 %v2150_v50, 0.0 }
 0x3c1   :  { %v2041_v49 = vadd.f32 %v2040_v36, %v4153_v15  ;;  %v2154_v48 = vadd.f32 %v2153_v46, %v4155_v16  ;;  %2601 = vmatprep.mubr.bf16.mxu1 %v2259_v18  ;;  %2698 = vmatprep.mubr.bf16.mxu0 %v2261_v33  ;;  %v2219_v58 = vmax.f32 %v2039_v45, 0.0  ;;  %v2221_v59 = vmax.f32 %v2152_v37, 0.0 }
 0x3c2   :  { %v2042_v53 = vpop.f32.mrf.mxu1  ;;  %v2155_v54 = vpop.f32.mrf.mxu0  ;;  %2602 = vmatmul.mubr.bf16.gmra.mxu1 %v2258_v34  ;;  %2699 = vmatmul.mubr.bf16.gmra.mxu0 %v2260_v35 }
 0x3c3   :  { %v2043_v38 = vadd.f32 %v2042_v53, %v4148_v12  ;;  %v2156_v55 = vadd.f32 %v2155_v54, %v4150_v13  ;;  %v2222_v39 = vmax.f32 %v2041_v49, 0.0  ;;  %v2224_v56 = vmax.f32 %v2154_v48, 0.0 }
 0x3c4   :  { %v2046_v57 = vpop.f32.mrf.mxu1  ;;  %v2159_v40 = vpop.f32.mrf.mxu0 }
 0x3c5   :  { %v2223_v60 = vmax.f32 %v2043_v38, 0.0  ;;  %v2225_v41 = vmax.f32 %v2156_v55, 0.0  ;;  %v2262_v1 = vpack.c.bf16 %v2222_v39, %v2218_v61  ;;  %v2264_v2 = vpack.c.bf16 %v2224_v56, %v2220_v62  ;;  %v4224_v61 = vld [vmem:[%s4258_s10] ss:$0 sm:$0xff] }
 0x3c6   :  { %v2048_v63 = vpop.f32.mrf.mxu1  ;;  %v2161_v52 = vpop.f32.mrf.mxu0  ;;  %v2047_v7 = vadd.f32 %v2046_v57, %v4153_v15  ;;  %v2160_v8 = vadd.f32 %v2159_v40, %v4155_v16 }
 0x3c7   :  { %v2263_v0 = vpack.c.bf16 %v2223_v60, %v2219_v58  ;;  %v2265_v51 = vpack.c.bf16 %v2225_v41, %v2221_v59  ;;  %v2049_v42 = vadd.f32 %v2048_v63, %v4148_v12  ;;  %v2162_v11 = vadd.f32 %v2161_v52, %v4150_v13 }
 0x3c8   :  { %v2050_v3 = vpop.f32.mrf.mxu1  ;;  %v2163_v5 = vpop.f32.mrf.mxu0  ;;  %v2226_v44 = vmax.f32 %v2047_v7, 0.0  ;;  %v2228_v26 = vmax.f32 %v2160_v8, 0.0 }
 0x3c9   :  { %v2051_v4 = vadd.f32 %v2050_v3, %v4153_v15  ;;  %v2164_v6 = vadd.f32 %v2163_v5, %v4155_v16  ;;  %2609 = vmatprep.mubr.bf16.mxu1 %v2263_v0  ;;  %2706 = vmatprep.mubr.bf16.mxu0 %v2265_v51  ;;  %v2227_v23 = vmax.f32 %v2049_v42, 0.0  ;;  %v2229_v43 = vmax.f32 %v2162_v11, 0.0 }
 0x3ca   :  { %v2052_v9 = vpop.f32.mrf.mxu1  ;;  %v2165_v10 = vpop.f32.mrf.mxu0  ;;  %2610 = vmatmul.mubr.bf16.gmra.mxu1 %v2262_v1  ;;  %2707 = vmatmul.mubr.bf16.gmra.mxu0 %v2264_v2 }
 0x3cb   :  { %v2053_v17 = vadd.f32 %v2052_v9, %v4148_v12  ;;  %v2166_v19 = vadd.f32 %v2165_v10, %v4150_v13  ;;  %v2230_v20 = vmax.f32 %v2051_v4, 0.0  ;;  %v2232_v14 = vmax.f32 %v2164_v6, 0.0 }
 0x3cc   :  { %v2056_v21 = vpop.f32.mrf.mxu1  ;;  %v2169_v22 = vpop.f32.mrf.mxu0 }
 0x3cd   :  { %v2231_v24 = vmax.f32 %v2053_v17, 0.0  ;;  %v2233_v25 = vmax.f32 %v2166_v19, 0.0  ;;  %v2266_v31 = vpack.c.bf16 %v2230_v20, %v2226_v44  ;;  %v2268_v32 = vpack.c.bf16 %v2232_v14, %v2228_v26 }
 0x3ce   :  { %v2058_v27 = vpop.f32.mrf.mxu1  ;;  %v2171_v28 = vpop.f32.mrf.mxu0  ;;  %v2057_v46 = vadd.f32 %v2056_v21, %v4153_v15  ;;  %v2170_v37 = vadd.f32 %v2169_v22, %v4155_v16 }
 0x3cf   :  { %v2267_v29 = vpack.c.bf16 %v2231_v24, %v2227_v23  ;;  %v2269_v30 = vpack.c.bf16 %v2233_v25, %v2229_v43  ;;  %v2059_v18 = vadd.f32 %v2058_v27, %v4148_v12  ;;  %v2172_v35 = vadd.f32 %v2171_v28, %v4150_v13 }
 0x3d0   :  { %v2060_v33 = vpop.f32.mrf.mxu1  ;;  %v2173_v34 = vpop.f32.mrf.mxu0  ;;  %v2234_v57 = vmax.f32 %v2057_v46, 0.0  ;;  %v2236_v40 = vmax.f32 %v2170_v37, 0.0 }
 0x3d1   :  { %v2061_v45 = vadd.f32 %v2060_v33, %v4153_v15  ;;  %v2174_v36 = vadd.f32 %v2173_v34, %v4155_v16  ;;  %2617 = vmatprep.mubr.bf16.mxu1 %v2267_v29  ;;  %2714 = vmatprep.mubr.bf16.mxu0 %v2269_v30  ;;  %v2235_v38 = vmax.f32 %v2059_v18, 0.0  ;;  %v2237_v55 = vmax.f32 %v2172_v35, 0.0 }
 0x3d2   :  { %v2062_v49 = vpop.f32.mrf.mxu1  ;;  %v2175_v48 = vpop.f32.mrf.mxu0  ;;  %2618 = vmatmul.mubr.bf16.gmra.mxu1 %v2266_v31  ;;  %2715 = vmatmul.mubr.bf16.gmra.mxu0 %v2268_v32 }
 0x3d3   :  { %v2063_v47 = vadd.f32 %v2062_v49, %v4148_v12  ;;  %v2176_v50 = vadd.f32 %v2175_v48, %v4150_v13  ;;  %v2238_v53 = vmax.f32 %v2061_v45, 0.0  ;;  %v2240_v54 = vmax.f32 %v2174_v36, 0.0 }
 0x3d5   :  { %v2239_v39 = vmax.f32 %v2063_v47, 0.0  ;;  %v2241_v56 = vmax.f32 %v2176_v50, 0.0  ;;  %v2270_v59 = vpack.c.bf16 %v2238_v53, %v2234_v57  ;;  %v2272_v16 = vpack.c.bf16 %v2240_v54, %v2236_v40 }
 0x3d7   :  { %v2271_v58 = vpack.c.bf16 %v2239_v39, %v2235_v38  ;;  %v2273_v15 = vpack.c.bf16 %v2241_v56, %v2237_v55 }
 0x3d9   :  { %2625 = vmatprep.mubr.bf16.mxu1 %v2271_v58  ;;  %2722 = vmatprep.mubr.bf16.mxu0 %v2273_v15 }
 0x3da   :  { %2626 = vmatmul.mubr.bf16.gmra.mxu1 %v2270_v59  ;;  %2723 = vmatmul.mubr.bf16.gmra.mxu0 %v2272_v16 }
 0x462   :  { %v2997_v60 = vpop.f32.mrf.mxu1  ;;  %v3061_v12 = vpop.f32.mrf.mxu0 }
 0x464   :  { %v2998_v41 = vpop.f32.mrf.mxu1  ;;  %v3062_v13 = vpop.f32.mrf.mxu0 }
 0x465   :  { %v2999_v62 = vadd.f32 %v2998_v41, %v2997_v60  ;;  %v3063_v0 = vadd.f32 %v3062_v13, %v3061_v12 }
 0x466   :  { %v3000_v63 = vpop.f32.mrf.mxu1  ;;  %v3064_v52 = vpop.f32.mrf.mxu0 }
 0x467   :  { %v2572_v51 = vadd.f32 %v2999_v62, %v4224_v61 }
 0x468   :  { %v3001_v1 = vpop.f32.mrf.mxu1  ;;  %v3065_v2 = vpop.f32.mrf.mxu0 }
 0x469   :  { %v3002_v42 = vadd.f32 %v3001_v1, %v3000_v63  ;;  %v2669_v3 = vadd.f32 %v3063_v0, %v2572_v51  ;;  %v3066_v6 = vadd.f32 %v3065_v2, %v3064_v52 }
 0x46a   :  { %v3003_v5 = vpop.f32.mrf.mxu1  ;;  %v3067_v11 = vpop.f32.mrf.mxu0 }
 0x46b   :  { %v2575_v4 = vadd.f32 %v3002_v42, %v4224_v61  ;;  %2731 = vxpose.xlu0.b32.start [1/16] (narrow) %v2669_v3, 16 }
 0x46c   :  { %v3004_v7 = vpop.f32.mrf.mxu1  ;;  %v3068_v8 = vpop.f32.mrf.mxu0 }
 0x46d   :  { %v3005_v9 = vadd.f32 %v3004_v7, %v3003_v5  ;;  %v2672_v10 = vadd.f32 %v3066_v6, %v2575_v4  ;;  %v3069_v14 = vadd.f32 %v3068_v8, %v3067_v11 }
 0x46e   :  { %v3006_v17 = vpop.f32.mrf.mxu1  ;;  %v3070_v19 = vpop.f32.mrf.mxu0 }
 0x46f   :  { %v2580_v20 = vadd.f32 %v3005_v9, %v4224_v61  ;;  %2732 = vxpose.xlu0.b32.cont [2/16] (narrow) %v2672_v10, 16 }
 0x470   :  { %v3007_v21 = vpop.f32.mrf.mxu1  ;;  %v3071_v22 = vpop.f32.mrf.mxu0 }
 0x471   :  { %v3008_v23 = vadd.f32 %v3007_v21, %v3006_v17  ;;  %v2677_v43 = vadd.f32 %v3069_v14, %v2580_v20  ;;  %v3072_v26 = vadd.f32 %v3071_v22, %v3070_v19 }
 0x472   :  { %v3009_v24 = vpop.f32.mrf.mxu1  ;;  %v3073_v25 = vpop.f32.mrf.mxu0 }
 0x473   :  { %v2583_v44 = vadd.f32 %v3008_v23, %v4224_v61  ;;  %2733 = vxpose.xlu0.b32.cont [3/16] (narrow) %v2677_v43, 16 }
 0x474   :  { %v3010_v27 = vpop.f32.mrf.mxu1  ;;  %v3074_v28 = vpop.f32.mrf.mxu0 }
 0x475   :  { %v3011_v29 = vadd.f32 %v3010_v27, %v3009_v24  ;;  %v2680_v30 = vadd.f32 %v3072_v26, %v2583_v44  ;;  %v3075_v33 = vadd.f32 %v3074_v28, %v3073_v25 }
 0x476   :  { %v3012_v31 = vpop.f32.mrf.mxu1  ;;  %v3076_v32 = vpop.f32.mrf.mxu0 }
 0x477   :  { %v2588_v18 = vadd.f32 %v3011_v29, %v4224_v61  ;;  %2734 = vxpose.xlu0.b32.cont [4/16] (narrow) %v2680_v30, 16 }
 0x478   :  { %v3013_v34 = vpop.f32.mrf.mxu1  ;;  %v3077_v35 = vpop.f32.mrf.mxu0 }
 0x479   :  { %v3014_v45 = vadd.f32 %v3013_v34, %v3012_v31  ;;  %v2685_v36 = vadd.f32 %v3075_v33, %v2588_v18  ;;  %v3078_v48 = vadd.f32 %v3077_v35, %v3076_v32 }
 0x47a   :  { %v3015_v46 = vpop.f32.mrf.mxu1  ;;  %v3079_v37 = vpop.f32.mrf.mxu0 }
 0x47b   :  { %v2591_v49 = vadd.f32 %v3014_v45, %v4224_v61  ;;  %2735 = vxpose.xlu0.b32.cont [5/16] (narrow) %v2685_v36, 16 }
 0x47c   :  { %v3016_v47 = vpop.f32.mrf.mxu1  ;;  %v3080_v50 = vpop.f32.mrf.mxu0 }
 0x47d   :  { %v3017_v53 = vadd.f32 %v3016_v47, %v3015_v46  ;;  %v2688_v54 = vadd.f32 %v3078_v48, %v2591_v49  ;;  %v3081_v56 = vadd.f32 %v3080_v50, %v3079_v37 }
 0x47e   :  { %v3018_v38 = vpop.f32.mrf.mxu1  ;;  %v3082_v55 = vpop.f32.mrf.mxu0 }
 0x47f   :  { %v2596_v39 = vadd.f32 %v3017_v53, %v4224_v61  ;;  %2736 = vxpose.xlu0.b32.cont [6/16] (narrow) %v2688_v54, 16 }
 0x480   :  { %v3019_v57 = vpop.f32.mrf.mxu1  ;;  %v3083_v40 = vpop.f32.mrf.mxu0 }
 0x481   :  { %v3020_v58 = vadd.f32 %v3019_v57, %v3018_v38  ;;  %v2693_v15 = vadd.f32 %v3081_v56, %v2596_v39  ;;  %v3084_v12 = vadd.f32 %v3083_v40, %v3082_v55 }
 0x482   :  { %v3021_v59 = vpop.f32.mrf.mxu1  ;;  %v3085_v16 = vpop.f32.mrf.mxu0 }
 0x483   :  { %v2599_v60 = vadd.f32 %v3020_v58, %v4224_v61  ;;  %2737 = vxpose.xlu0.b32.cont [7/16] (narrow) %v2693_v15, 16 }
 0x484   :  { %v3022_v41 = vpop.f32.mrf.mxu1  ;;  %v3086_v13 = vpop.f32.mrf.mxu0 }
 0x485   :  { %v3023_v62 = vadd.f32 %v3022_v41, %v3021_v59  ;;  %v2696_v63 = vadd.f32 %v3084_v12, %v2599_v60  ;;  %v3087_v1 = vadd.f32 %v3086_v13, %v3085_v16 }
 0x486   :  { %v3024_v52 = vpop.f32.mrf.mxu1  ;;  %v3088_v0 = vpop.f32.mrf.mxu0 }
 0x487   :  { %v2604_v51 = vadd.f32 %v3023_v62, %v4224_v61  ;;  %2738 = vxpose.xlu0.b32.cont [8/16] (narrow) %v2696_v63, 16 }
 0x488   :  { %v3025_v2 = vpop.f32.mrf.mxu1  ;;  %v3089_v42 = vpop.f32.mrf.mxu0 }
 0x489   :  { %v3026_v3 = vadd.f32 %v3025_v2, %v3024_v52  ;;  %v2701_v5 = vadd.f32 %v3087_v1, %v2604_v51  ;;  %v3090_v7 = vadd.f32 %v3089_v42, %v3088_v0 }
 0x48a   :  { %v3027_v11 = vpop.f32.mrf.mxu1  ;;  %v3091_v4 = vpop.f32.mrf.mxu0 }
 0x48b   :  { %v2607_v6 = vadd.f32 %v3026_v3, %v4224_v61  ;;  %2739 = vxpose.xlu0.b32.cont [9/16] (narrow) %v2701_v5, 16 }
 0x48c   :  { %v3028_v8 = vpop.f32.mrf.mxu1  ;;  %v3092_v9 = vpop.f32.mrf.mxu0 }
 0x48d   :  { %v3029_v10 = vadd.f32 %v3028_v8, %v3027_v11  ;;  %v2704_v17 = vadd.f32 %v3090_v7, %v2607_v6  ;;  %v3093_v21 = vadd.f32 %v3092_v9, %v3091_v4 }
 0x48e   :  { %v3030_v19 = vpop.f32.mrf.mxu1  ;;  %v3094_v20 = vpop.f32.mrf.mxu0 }
 0x48f   :  { %v2612_v14 = vadd.f32 %v3029_v10, %v4224_v61  ;;  %2740 = vxpose.xlu0.b32.cont [10/16] (narrow) %v2704_v17, 16 }
 0x490   :  { %v3031_v22 = vpop.f32.mrf.mxu1  ;;  %v3095_v23 = vpop.f32.mrf.mxu0 }
 0x491   :  { %v3032_v43 = vadd.f32 %v3031_v22, %v3030_v19  ;;  %v2709_v24 = vadd.f32 %v3093_v21, %v2612_v14  ;;  %v3096_v27 = vadd.f32 %v3095_v23, %v3094_v20 }
 0x492   :  { %v3033_v25 = vpop.f32.mrf.mxu1  ;;  %v3097_v44 = vpop.f32.mrf.mxu0 }
 0x493   :  { %v2615_v26 = vadd.f32 %v3032_v43, %v4224_v61  ;;  %2741 = vxpose.xlu0.b32.cont [11/16] (narrow) %v2709_v24, 16 }
 0x494   :  { %v3034_v28 = vpop.f32.mrf.mxu1  ;;  %v3098_v29 = vpop.f32.mrf.mxu0 }
 0x495   :  { %v3035_v30 = vadd.f32 %v3034_v28, %v3033_v25  ;;  %v2712_v31 = vadd.f32 %v3096_v27, %v2615_v26  ;;  %v3099_v34 = vadd.f32 %v3098_v29, %v3097_v44 }
 0x496   :  { %v3036_v32 = vpop.f32.mrf.mxu1  ;;  %v3100_v18 = vpop.f32.mrf.mxu0 }
 0x497   :  { %v2620_v33 = vadd.f32 %v3035_v30, %v4224_v61  ;;  %2742 = vxpose.xlu0.b32.cont [12/16] (narrow) %v2712_v31, 16 }
 0x498   :  { %v3037_v35 = vpop.f32.mrf.mxu1  ;;  %v3101_v45 = vpop.f32.mrf.mxu0 }
 0x499   :  { %v3038_v36 = vadd.f32 %v3037_v35, %v3036_v32  ;;  %v2717_v46 = vadd.f32 %v3099_v34, %v2620_v33  ;;  %v3102_v47 = vadd.f32 %v3101_v45, %v3100_v18 }
 0x49a   :  { %v3039_v37 = vpop.f32.mrf.mxu1  ;;  %v3103_v49 = vpop.f32.mrf.mxu0 }
 0x49b   :  { %v2623_v48 = vadd.f32 %v3038_v36, %v4224_v61  ;;  %2743 = vxpose.xlu0.b32.cont [13/16] (narrow) %v2717_v46, 16 }
 0x49c   :  { %v3040_v50 = vpop.f32.mrf.mxu1  ;;  %v3104_v53 = vpop.f32.mrf.mxu0 }
 0x49d   :  { %v3041_v54 = vadd.f32 %v3040_v50, %v3039_v37  ;;  %v2720_v38 = vadd.f32 %v3102_v47, %v2623_v48  ;;  %v3105_v57 = vadd.f32 %v3104_v53, %v3103_v49 }
 0x49e   :  { %v3042_v55 = vpop.f32.mrf.mxu1  ;;  %v3106_v39 = vpop.f32.mrf.mxu0 }
 0x49f   :  { %v2628_v56 = vadd.f32 %v3041_v54, %v4224_v61  ;;  %2744 = vxpose.xlu0.b32.cont [14/16] (narrow) %v2720_v38, 16 }
 0x4a0   :  { %v3043_v40 = vpop.f32.mrf.mxu1  ;;  %v3107_v58 = vpop.f32.mrf.mxu0 }
 0x4a1   :  { %v3044_v15 = vadd.f32 %v3043_v40, %v3042_v55  ;;  %v2725_v59 = vadd.f32 %v3105_v57, %v2628_v56  ;;  %v3108_v60 = vadd.f32 %v3107_v58, %v3106_v39 }
 0x4a3   :  { %v2631_v16 = vadd.f32 %v3044_v15, %v4224_v61  ;;  %2745 = vxpose.xlu0.b32.cont [15/16] (narrow) %v2725_v59, 16 }
 0x4a5   :  { %v2728_v12 = vadd.f32 %v3108_v60, %v2631_v16 }
 0x4a7   :  { %2746 = vxpose.xlu0.b32.end [16/16] (narrow) %v2728_v12, 16 }
 0x4e7   :  { %v2747_v41 = vpop.trf.xlu0 }
 0x4e8   :  { %2763 = vst [vmem:[%s4259_s11] sm:$0xff] %v2747_v41 }
 0x4eb   :  { %v2748_v13 = vpop.trf.xlu0 }
 0x4ec   :  { %2764 = vst [vmem:[%s4259_s11 + $0x8] sm:$0xff] %v2748_v13 }
 0x4ed   :  { %2769 = vsyncpa [#allocation3], 1 }
 0x4ee   :  { %2770 = vsyncpa [#allocation5], 1 }

</bundles_post_ra>
